<compile_context>
chip_gen: v7x
topology: tpu7x:2x2x1
jax: 0.10.0
libtpu: 0.0.40
codegen_flags: <defaults>
</compile_context>

<pallas_src>
import functools
import math

import jax
import jax.numpy as jnp
from jax import lax
from jax.experimental import pallas as pl
from jax.experimental.pallas import tpu as pltpu

# ----------------------------------------------------------------------------
# config (mirrors config_GAICD at small scale)
# ----------------------------------------------------------------------------
CFG = dict(
    reduced_dim=32,
    use_partition_aware=True,
    partition_aware_type=9,
    concat_with_human=True,
    use_content_preserve=True,
    content_preserve_type="gcn",
    only_content_preserve=False,
)
CP_DIM = 256
ALIGNSIZE = 9
DOWNSAMPLE = 4
SPATIAL_SCALE = 1.0 / (2 ** DOWNSAMPLE)


def _device_kind():
    try:
        return jax.devices()[0].device_kind.lower()
    except Exception:  # pragma: no cover
        return ""


_KIND = _device_kind()
IS_V7X = "v7" in _KIND
# v6e/v7x: 2x256x256 MXU -> 256-aligned tiles; v5e (4x128x128) keeps 128.
TM_TILE = 256 if ("v6" in _KIND or "v7" in _KIND) else 128
# Full-K / full-M blocks are used when the double-buffered bf16 tiles fit this
# budget (well under the 32 MiB scoped VMEM default on v5e/v6e/v7x, and safe
# for v7x's 64 MiB physical VMEM).
_VMEM_BUDGET = 20 * 1024 * 1024


def _round_up(x, m):
    return ((x + m - 1) // m) * m


# ----------------------------------------------------------------------------
# Pallas matmul kernel (bias + activation epilogue fused)
# ----------------------------------------------------------------------------
def _matmul_kernel(a_ref, b_ref, bias_ref, o_ref, acc_ref, *, activation):
    @pl.when(pl.program_id(2) == 0)
    def _():
        acc_ref[...] = jnp.zeros_like(acc_ref)

    acc_ref[...] += jnp.dot(a_ref[...], b_ref[...],
                            preferred_element_type=jnp.float32)

    @pl.when(pl.program_id(2) == pl.num_programs(2) - 1)
    def _():
        out = acc_ref[...] + bias_ref[...]
        if activation == "relu":
            out = jnp.maximum(out, 0.0)
        elif activation == "sigmoid":
            # exact divide in the once-per-tile epilogue (parity over approx).
            out = 1.0 / (1.0 + jnp.exp(-out))
        o_ref[...] = out.astype(o_ref.dtype)


def _pick_tm(M):
    if M <= 1024:
        return M                      # full-dim block: zero M padding
    return TM_TILE                    # big-M: MXU-aligned tiles (pad if ragged)


def _pick_tn(N):
    if N <= 256:
        return N                      # full-dim: no channel pad / output slice
    if N % 256 == 0:
        if IS_V7X:
            return 256                # >=2 N tiles keeps both v7x TCs busy
        return 512 if N % 512 == 0 else 256
    if N <= 512:
        return N                      # odd width: masked vst beats pad+slice
    return 128                        # rare: pad + slice


def _pick_tk(K, tm, tn):
    # Full-K block (no K padding, single K step) whenever the double-buffered
    # bf16 A/B tiles plus the f32 accumulator fit the VMEM budget.
    if 2 * 2 * K * (tm + tn) + 4 * tm * tn <= _VMEM_BUDGET:
        return K
    return 512                        # rare: 256-multiple K tiles (pads K)


def _dense_fallback(a, b, bias, activation):
    # bf16 inputs / f32 accumulate: these small-M matmuls are weight-read bound.
    out = jnp.dot(a.astype(jnp.bfloat16), b.astype(jnp.bfloat16),
                  preferred_element_type=jnp.float32)
    if bias is not None:
        out = out + bias.reshape(1, -1).astype(jnp.float32)
    if activation == "relu":
        out = jnp.maximum(out, 0.0)
    elif activation == "sigmoid":
        out = jax.nn.sigmoid(out)
    return out


def pallas_matmul(a, b, bias=None, activation=None):
    """a: (M, K); b: (K, N) prepacked bf16; bias: (N,) f32 or None -> (M, N) f32."""
    M, K = a.shape
    K2, N = b.shape
    assert K == K2

    # Tiny matmuls: MXU padding + launch overhead exceeds the useful work.
    if M < 32 or N < 8:
        return _dense_fallback(a, b, bias, activation)

    tm = _pick_tm(M)
    tn = _pick_tn(N)
    tk = _pick_tk(K, tm, tn)
    Mp, Kp, Np = _round_up(M, tm), _round_up(K, tk), _round_up(N, tn)

    a_p = a.astype(jnp.bfloat16)                 # no-op if already bf16
    b_p = b.astype(jnp.bfloat16)
    if (Mp, Kp) != (M, K):
        a_p = jnp.pad(a_p, ((0, Mp - M), (0, Kp - K)))
    if (Kp, Np) != (K, N):
        b_p = jnp.pad(b_p, ((0, Kp - K), (0, Np - N)))
    if bias is None:
        bias_p = jnp.zeros((1, Np), jnp.float32)
    else:
        bias_p = bias.reshape(1, -1).astype(jnp.float32)
        if Np != N:
            bias_p = jnp.pad(bias_p, ((0, 0), (0, Np - N)))

    out = pl.pallas_call(
        functools.partial(_matmul_kernel, activation=activation),
        out_shape=jax.ShapeDtypeStruct((Mp, Np), jnp.float32),
        grid_spec=pltpu.PrefetchScalarGridSpec(
            num_scalar_prefetch=0,
            grid=(Mp // tm, Np // tn, Kp // tk),
            in_specs=[
                pl.BlockSpec((tm, tk), lambda i, j, k: (i, k)),
                pl.BlockSpec((tk, tn), lambda i, j, k: (k, j)),
                pl.BlockSpec((1, tn), lambda i, j, k: (0, j)),
            ],
            out_specs=pl.BlockSpec((tm, tn), lambda i, j, k: (i, j)),
            scratch_shapes=[pltpu.VMEM((tm, tn), jnp.float32)],
        ),
        compiler_params=pltpu.CompilerParams(
            dimension_semantics=("parallel", "parallel", "arbitrary")),
    )(a_p, b_p, bias_p)
    if (Mp, Np) != (M, N):
        out = out[:M, :N]
    return out


# ----------------------------------------------------------------------------
# conv / linear / pooling / resize helpers (NHWC everywhere)
# ----------------------------------------------------------------------------
def conv2d_spatial(x, w_hwio, b=None, padding=0, activation=None,
                   out_dtype=jnp.float32):
    """Spatial conv via XLA's native TPU convolution (no XLA-side im2col).
    x: (B,H,W,Cin); w_hwio: (kh,kw,Cin,Cout) prepacked bf16."""
    out = lax.conv_general_dilated(
        x.astype(jnp.bfloat16), w_hwio, window_strides=(1, 1),
        padding=[(padding, padding), (padding, padding)],
        dimension_numbers=("NHWC", "HWIO", "NHWC"),
        preferred_element_type=jnp.float32)
    if b is not None:
        out = out + b.reshape(1, 1, 1, -1)
    if activation == "relu":
        out = jnp.maximum(out, 0.0)
    elif activation == "sigmoid":
        out = jax.nn.sigmoid(out)
    return out.astype(out_dtype)


def conv1x1(x, w_kn, b=None, activation=None):
    """1x1 conv as a Pallas matmul. x: (B,H,W,Cin); w_kn: (Cin,Cout) bf16."""
    B, H, W, Cin = x.shape
    out = pallas_matmul(x.reshape(B * H * W, Cin), w_kn, bias=b,
                        activation=activation)
    return out.reshape(B, H, W, -1)


def linear(x, w_kn, b=None, activation=None):
    return pallas_matmul(x, w_kn, bias=b, activation=activation)


def maxpool2x2(x):
    B, H, W, C = x.shape
    return x.reshape(B, H // 2, 2, W // 2, 2, C).max(axis=(2, 4))


def _interp_matrix(in_size, out_size):
    """align_corners=True bilinear interpolation as a constant (out,in) matrix."""
    pos = jnp.linspace(0.0, float(in_size - 1), out_size)
    lo = jnp.clip(jnp.floor(pos), 0.0, float(in_size - 1))
    hi = jnp.minimum(lo + 1.0, float(in_size - 1))
    w = (pos - lo).astype(jnp.float32)
    cols = jnp.arange(in_size)
    lo_i = lo.astype(jnp.int32)[:, None]
    hi_i = hi.astype(jnp.int32)[:, None]
    m = ((1.0 - w)[:, None] * (cols[None, :] == lo_i)
         + w[:, None] * (cols[None, :] == hi_i))
    return m.astype(jnp.float32)


def bilinear_resize(x, out_h, out_w):
    """F.interpolate(mode='bilinear', align_corners=True) via two constant
    interpolation matmuls (no gathers)."""
    B, H, W, C = x.shape
    if H == out_h and W == out_w:
        return x
    wy = _interp_matrix(H, out_h)                       # (out_h, H)
    wx = _interp_matrix(W, out_w)                       # (out_w, W)
    xf = x.astype(jnp.float32)
    t = jnp.einsum("ph,bhwc->bpwc", wy, xf)
    out = jnp.einsum("qw,bpwc->bpqc", wx, t)
    return out.astype(x.dtype)


def _bilinear_sample(fmap, cy, cx):
    """fmap: (H, W, C); cy/cx: (S,) -> (S, S, C)."""
    H, W, C = fmap.shape
    cy = jnp.clip(cy, 0.0, H - 1.0)
    cx = jnp.clip(cx, 0.0, W - 1.0)
    y0 = jnp.floor(cy).astype(jnp.int32)
    x0 = jnp.floor(cx).astype(jnp.int32)
    y1 = jnp.minimum(y0 + 1, H - 1)
    x1 = jnp.minimum(x0 + 1, W - 1)
    wy = (cy - y0)[:, None, None]
    wx = (cx - x0)[None, :, None]
    r0, r1 = fmap[y0, :, :], fmap[y1, :, :]
    v00, v01 = r0[:, x0, :], r0[:, x1, :]
    v10, v11 = r1[:, x0, :], r1[:, x1, :]
    return (1 - wy) * ((1 - wx) * v00 + wx * v01) + wy * ((1 - wx) * v10 + wx * v11)


def roi_align_avg(feat, rois, out_size, spatial_scale):
    # TODO(synk): exact RoIAlignAvg CUDA-op semantics unavailable; bin-center
    # bilinear sampling approximation.
    idx = rois[:, 0].astype(jnp.int32)
    boxes = rois[:, 1:] * spatial_scale
    grid = (jnp.arange(out_size, dtype=jnp.float32) + 0.5) / out_size

    def one(fmap, box):
        x1, y1, x2, y2 = box[0], box[1], box[2], box[3]
        cx = x1 + grid * (x2 - x1)
        cy = y1 + grid * (y2 - y1)
        return _bilinear_sample(fmap, cy, cx)

    return jax.vmap(one)(feat[idx], boxes)


def rod_align_avg(feat, rois, out_size, spatial_scale):
    # TODO(synk): exact RoDAlignAvg CUDA-op semantics unavailable; approximate
    # as align over the full map with the RoI interior zeroed out.
    B, H, W, C = feat.shape
    idx = rois[:, 0].astype(jnp.int32)
    boxes = rois[:, 1:] * spatial_scale
    ys = jnp.arange(H, dtype=jnp.float32)[:, None]
    xs = jnp.arange(W, dtype=jnp.float32)[None, :]
    grid = (jnp.arange(out_size, dtype=jnp.float32) + 0.5) / out_size
    cy = grid * (H - 1.0)
    cx = grid * (W - 1.0)

    def one(fmap, box):
        x1, y1, x2, y2 = box[0], box[1], box[2], box[3]
        inside = (xs >= x1) & (xs <= x2) & (ys >= y1) & (ys <= y2)
        masked = jnp.where(inside[..., None], 0.0, fmap)
        return _bilinear_sample(masked, cy, cx)

    return jax.vmap(one)(feat[idx], boxes)


# ----------------------------------------------------------------------------
# Graph reasoning (tiny: L=16, C=32, O=8 -> plain jnp, no custom-call boundary)
# ----------------------------------------------------------------------------
def graph_reasoning(feat_map, w_phi_t, w_theta_t, w_out):
    """feat_map: (B,H,W,C) NHWC; w_phi_t/w_theta_t: (C,inter); w_out: (C,O)."""
    B, H, W, C = feat_map.shape
    feat = feat_map.reshape(B, H * W, C).astype(jnp.float32)
    phi = feat @ w_phi_t
    theta = feat @ w_theta_t
    product = jnp.einsum("bld,bmd->blm", phi, theta)
    phi_n = jnp.sqrt(jnp.sum(phi * phi, axis=-1, keepdims=True))
    theta_n = jnp.sqrt(jnp.sum(theta * theta, axis=-1, keepdims=True))
    norms = phi_n * jnp.swapaxes(theta_n, 1, 2)
    sim = jax.nn.softmax(product / (norms + 1e-12), axis=-1)   # exact softmax
    out = jnp.einsum("blm,bmc->blc", sim, feat)
    out = jnp.maximum(out @ w_out, 0.0)                        # ReLU
    return out.reshape(B, H, W, -1)


# ----------------------------------------------------------------------------
# deterministic parameter init (synthetic weights, PREPACKED layouts)
# ----------------------------------------------------------------------------
_BASE_KEY = jax.random.PRNGKey(0)
_CNT = [0]


def _nk():
    _CNT[0] += 1
    return jax.random.fold_in(_BASE_KEY, _CNT[0])


def conv_param(cout, cin, k, bias=True):
    """Spatial conv weight, prepacked HWIO bf16 + f32 bias."""
    std = math.sqrt(2.0 / (cin * k * k))
    w = (jax.random.normal(_nk(), (k, k, cin, cout), jnp.float32) * std
         ).astype(jnp.bfloat16)
    b = jnp.zeros((cout,), jnp.float32) if bias else None
    return w, b


def conv1x1_param(cout, cin, bias=True):
    """1x1 conv weight, prepacked (Cin, Cout) bf16 matmul operand + f32 bias."""
    std = math.sqrt(2.0 / cin)
    w = (jax.random.normal(_nk(), (cin, cout), jnp.float32) * std
         ).astype(jnp.bfloat16)
    b = jnp.zeros((cout,), jnp.float32) if bias else None
    return w, b


def linear_param(out_d, in_d, bias=True):
    """Linear weight, prepacked (in, out) bf16 + f32 bias."""
    std = math.sqrt(1.0 / in_d)
    w = (jax.random.normal(_nk(), (in_d, out_d), jnp.float32) * std
         ).astype(jnp.bfloat16)
    b = jnp.zeros((out_d,), jnp.float32) if bias else None
    return w, b


def init_params():
    rd = CFG["reduced_dim"]
    human_dim = rd // 2
    p = {}
    vgg_cfg = [[(64, 3), (64, 64)],
               [(128, 64), (128, 128)],
               [(256, 128), (256, 256), (256, 256)],
               [(512, 256), (512, 512), (512, 512)],
               [(512, 512), (512, 512), (512, 512)]]
    p["vgg"] = [[conv_param(co, ci, 3) for (co, ci) in blk] for blk in vgg_cfg]
    # Fused f3/f4/f5 lateral 1x1 convs: K-stacked weight, summed bias (prepacked).
    w3, b3 = conv1x1_param(256, 512)
    w4, b4 = conv1x1_param(256, 512)
    w5, b5 = conv1x1_param(256, 512)
    p["lat_w"] = jnp.concatenate([w3, w4, w5], axis=0)          # (1536, 256) bf16
    p["lat_b"] = b3 + b4 + b5
    p["feat_ext"] = conv1x1_param(rd, 256)
    # PartitionAwareModule (partition=9, concat_with_human=True)
    p["pa_group_conv"] = conv_param(rd * 9, rd + human_dim, 3)
    p["pa_roi_conv"] = conv_param(human_dim, rd, 3)
    # ContentPreserveModule (gcn mode): GraphReasoning(rd, rd, 8)
    p["gcn_phi_t"] = (jax.random.normal(_nk(), (rd, rd), jnp.float32)
                      * math.sqrt(1.0 / rd))
    p["gcn_theta_t"] = (jax.random.normal(_nk(), (rd, rd), jnp.float32)
                        * math.sqrt(1.0 / rd))
    p["gcn_out"] = (jax.random.normal(_nk(), (rd, 8), jnp.float32)
                    * math.sqrt(2.0 / (rd + 8)))                # xavier-ish
    p["pp_conv1"] = conv_param(8, 8, 3)
    p["pp_conv2"] = conv1x1_param(1, 8)
    p["cf_conv1"] = conv_param(64, 2, 5)
    p["cf_conv2"] = conv_param(32, 64, 5)
    p["cf_fc"] = linear_param(CP_DIM, 5408)
    # roi_feat_layer
    p["roi_conv"] = conv_param(512, rd * 2, ALIGNSIZE)
    p["roi_fc"] = linear_param(256, 512, bias=False)[0]
    p["fc"] = linear_param(1, 256 + CP_DIM)
    return p


# ----------------------------------------------------------------------------
# module forwards (NHWC internally, bf16 trunk activations)
# ----------------------------------------------------------------------------
def vgg_forward(vgg_p, x):
    def block(x, convs):
        for w, b in convs:
            x = conv2d_spatial(x, w, b, padding=1, activation="relu",
                               out_dtype=jnp.bfloat16)
        return x

    x = maxpool2x2(block(x, vgg_p[0]))
    x = maxpool2x2(block(x, vgg_p[1]))
    x = maxpool2x2(block(x, vgg_p[2]))
    f3 = block(x, vgg_p[3])                    # /8,  512ch
    f4 = block(maxpool2x2(f3), vgg_p[4])       # /16, 512ch
    f5 = maxpool2x2(f4)                        # /32, 512ch
    return f3, f4, f5


def partition_aware_forward(p, x, human_rois, partition_mask):
    # x: (B, H, W, C) NHWC f32; partition_mask: (B, 9, H, W)
    B, H, W, C = x.shape
    human_roi = roi_align_avg(x, human_rois, 3, SPATIAL_SCALE)      # (B,3,3,C)
    human_roi = conv2d_spatial(human_roi, *p["pa_roi_conv"])        # (B,1,1,C/2)
    human_roi = jnp.broadcast_to(human_roi, (B, H, W, human_roi.shape[-1]))
    cat_feat = jnp.concatenate([x, human_roi], axis=-1)
    p_conv = conv2d_spatial(cat_feat, *p["pa_group_conv"], padding=1,
                            activation="relu")                      # (B,H,W,9C)
    # channel layout is partition-major (matches torch.chunk along channels)
    p_feat = p_conv.reshape(B, H, W, 9, C)
    p_mean = jnp.transpose(jnp.mean(p_feat, axis=-1), (0, 3, 1, 2)) # (B,9,H,W)
    mask = jnp.transpose(partition_mask, (0, 2, 3, 1))              # (B,H,W,9)
    fused = jnp.sum(p_feat * mask[..., None], axis=3)               # (B,H,W,C)
    return x + fused, p_mean


def content_preserve_forward(p, feat_map, crop_mask):
    # feat_map: (B, h, w, C) NHWC f32; crop_mask: (B, N, 64, 64)
    relation_feat = graph_reasoning(feat_map, p["gcn_phi_t"], p["gcn_theta_t"],
                                    p["gcn_out"])                   # (B,h,w,8)
    x = bilinear_resize(relation_feat, 64, 64)
    x = conv2d_spatial(x, *p["pp_conv1"], padding=1, activation="relu")
    Bh, Hh, Wh, C8 = x.shape
    heat = pallas_matmul(x.reshape(-1, C8), p["pp_conv2"][0],
                         p["pp_conv2"][1], activation="sigmoid")    # N=1 head
    heat_map = heat.reshape(Bh, Hh, Wh, 1)                          # (B,64,64,1)

    B, N, H, W = crop_mask.shape
    heat_hw = heat_map[:, :, :, 0]                                  # (B,64,64)
    rep_heat = jnp.broadcast_to(heat_hw[:, None], (B, N, H, W))
    cat_map = jnp.stack([rep_heat, crop_mask], axis=-1).reshape(B * N, H, W, 2)
    y = conv2d_spatial(cat_map, *p["cf_conv1"], out_dtype=jnp.bfloat16)
    y = maxpool2x2(y)                                               # 30x30
    y = conv2d_spatial(y, *p["cf_conv2"], out_dtype=jnp.bfloat16)
    y = maxpool2x2(y)                                               # 13x13
    # PyTorch Flatten is channel-major: go back to NCHW before flattening.
    y = jnp.transpose(y, (0, 3, 1, 2)).reshape(y.shape[0], -1)      # (BN,5408)
    cont_feat = linear(y, *p["cf_fc"])                              # (BN,256)
    heat_map_nchw = jnp.transpose(heat_map, (0, 3, 1, 2))           # (B,1,64,64)
    return heat_map_nchw, cont_feat


def forward(p, im, crop_box, human_box, crop_mask, human_mask, *,
            contain_human=True):
    B, N, _ = crop_box.shape
    idx = jnp.broadcast_to(jnp.arange(B, dtype=jnp.float32)[:, None, None],
                           (B, N, 1))
    crop_rois = jnp.concatenate([idx, crop_box], axis=-1).reshape(-1, 5)
    hidx = jnp.arange(B, dtype=jnp.float32)[:, None, None]
    human_rois = jnp.concatenate([hidx, human_box], axis=-1).reshape(-1, 5)

    x = jnp.transpose(im, (0, 2, 3, 1)).astype(jnp.bfloat16)   # NCHW -> NHWC
    f3, f4, f5 = vgg_forward(p["vgg"], x)
    th, tw = f4.shape[1], f4.shape[2]
    f3 = bilinear_resize(f3, th, tw)
    f5 = bilinear_resize(f5, th, tw)
    lat = jnp.concatenate([f3, f4, f5], axis=-1)               # (B,h,w,1536) bf16
    agg_feat = conv1x1(lat, p["lat_w"], p["lat_b"])            # fused laterals
    red_feat = conv1x1(agg_feat, *p["feat_ext"])               # (B,h,w,rd) f32

    part_feat = jnp.zeros_like(human_mask)
    if CFG["use_partition_aware"] and contain_human:
        red_feat, part_feat = partition_aware_forward(p, red_feat, human_rois,
                                                      human_mask)

    roi_feat = roi_align_avg(red_feat, crop_rois, ALIGNSIZE, SPATIAL_SCALE)
    rod_feat = rod_align_avg(red_feat, crop_rois, ALIGNSIZE, SPATIAL_SCALE)
    cat_feat = jnp.concatenate([roi_feat, rod_feat], axis=-1)  # (BN,9,9,2rd)
    xr = conv2d_spatial(cat_feat, *p["roi_conv"], activation="relu")
    xr = xr.reshape(xr.shape[0], -1)                           # (BN,512)
    crop_feat = linear(xr, p["roi_fc"])                        # (BN,256)

    heat_map = jnp.zeros_like(crop_mask[:, 0:1])
    if CFG["use_content_preserve"]:
        heat_map, cont_feat = content_preserve_forward(p, red_feat, crop_mask)
        if CFG["only_content_preserve"]:
            crop_feat = cont_feat
        else:
            crop_feat = jnp.concatenate([crop_feat, cont_feat], axis=1)

    crop_score = linear(crop_feat, *p["fc"])                   # (BN,1)
    score = crop_score.reshape(B, N)
    return part_feat, heat_map, score


forward_jit = jax.jit(forward, static_argnames=("contain_human",))


# ----------------------------------------------------------------------------
if __name__ == "__main__":
    B, N = 2, 8
    key = jax.random.PRNGKey(0)
    ks = jax.random.split(key, 10)
    im = jax.random.normal(ks[0], (B, 3, 64, 64), jnp.float32)
    x1 = jax.random.uniform(ks[1], (B, N, 1), minval=0.0, maxval=20.0)
    y1 = jax.random.uniform(ks[2], (B, N, 1), minval=0.0, maxval=20.0)
    x2 = x1 + jax.random.uniform(ks[3], (B, N, 1), minval=24.0, maxval=40.0)
    y2 = y1 + jax.random.uniform(ks[4], (B, N, 1), minval=24.0, maxval=40.0)
    crop_box = jnp.concatenate([x1, y1, x2, y2], axis=-1)           # (B,N,4)
    hx1 = jax.random.uniform(ks[5], (B, 1, 1), minval=4.0, maxval=16.0)
    hy1 = jax.random.uniform(ks[6], (B, 1, 1), minval=4.0, maxval=16.0)
    human_box = jnp.concatenate([hx1, hy1, hx1 + 24.0, hy1 + 32.0], axis=-1)
    crop_mask = (jax.random.uniform(ks[7], (B, N, 64, 64)) > 0.5).astype(jnp.float32)
    human_mask = jax.random.uniform(ks[8], (B, 9, 4, 4), jnp.float32)

    params = init_params()
    # Static flag computed once on the host (mirrors the torch data-dependent
    # branch without putting a device->host sync inside the jitted graph).
    contain_human = bool(jnp.count_nonzero(human_mask[0, 4]) > 0)

    part_feat, heat_map, score = forward_jit(params, im, crop_box, human_box,
                                             crop_mask, human_mask,
                                             contain_human=contain_human)
    jax.block_until_ready((part_feat, heat_map, score))
    assert part_feat.shape == (B, 9, 4, 4)
    assert heat_map.shape == (B, 1, 64, 64)
    assert score.shape == (B, N)
    assert bool(jnp.all(jnp.isfinite(score)))
    print("KERNEL_OK")
</pallas_src>

<mosaic_0001>
module attributes {stable_mosaic.version = 11 : i64} {
  func.func @_matmul_kernel(%arg0: i32, %arg1: i32, %arg2: i32, %arg3: memref<32x1536xbf16, #tpu.memory_space<vmem>>, %arg4: memref<1536x256xbf16, #tpu.memory_space<vmem>>, %arg5: memref<1x256xf32, #tpu.memory_space<vmem>>, %arg6: memref<32x256xf32, #tpu.memory_space<vmem>>, %arg7: memref<32x256xf32, #tpu.memory_space<vmem>>) attributes {dimension_semantics = [#tpu.dimension_semantics<parallel>, #tpu.dimension_semantics<parallel>, #tpu.dimension_semantics<arbitrary>], iteration_bounds = array<i64: 1, 1, 1>, scalar_prefetch = 0 : i64, scratch_operands = 1 : i64, tpu.core_type = #tpu.core_type<tc>, window_params = [{transform_indices = @transform_0, window_bounds = array<i64: 32, 1536>}, {transform_indices = @transform_1, window_bounds = array<i64: 1536, 256>}, {transform_indices = @transform_2, window_bounds = array<i64: 1, 256>}, {transform_indices = @transform_3, window_bounds = array<i64: 32, 256>}]} {
    %c0_i32 = arith.constant 0 : i32
    %0 = arith.cmpi eq, %arg2, %c0_i32 : i32
    %1 = arith.extui %0 : i1 to i32
    %c0_i32_0 = arith.constant 0 : i32
    %2 = arith.cmpi ne, %1, %c0_i32_0 : i32
    scf.if %2 {
      %cst_10 = arith.constant 0.000000e+00 : f32
      %12 = vector.broadcast %cst_10 : f32 to vector<32x256xf32>
      %c0_11 = arith.constant 0 : index
      %c0_12 = arith.constant 0 : index
      %13 = vector.load %arg7[%c0_11, %c0_12] : memref<32x256xf32, #tpu.memory_space<vmem>>, vector<32x256xf32>
      tpu.vector_store %arg7[%c0_11, %c0_12], %12 {strides = array<i32>} : memref<32x256xf32, #tpu.memory_space<vmem>>, vector<32x256xf32>,
    } else {
    }
    %c0 = arith.constant 0 : index
    %c0_1 = arith.constant 0 : index
    %3 = vector.load %arg7[%c0, %c0_1] : memref<32x256xf32, #tpu.memory_space<vmem>>, vector<32x256xf32>
    %c0_2 = arith.constant 0 : index
    %c0_3 = arith.constant 0 : index
    %4 = vector.load %arg3[%c0_2, %c0_3] : memref<32x1536xbf16, #tpu.memory_space<vmem>>, vector<32x1536xbf16>
    %c0_4 = arith.constant 0 : index
    %c0_5 = arith.constant 0 : index
    %5 = vector.load %arg4[%c0_4, %c0_5] : memref<1536x256xbf16, #tpu.memory_space<vmem>>, vector<1536x256xbf16>
    %cst = arith.constant dense<0.000000e+00> : vector<32x256xf32>
    %6 = tpu.matmul %4, %5, %cst {dimension_numbers = #tpu.dot_dimension_numbers<[1], [0], [0], [1], [0, 0, 1, 1], [], []>} : vector<32x1536xbf16>, vector<1536x256xbf16>, vector<32x256xf32> -> vector<32x256xf32>
    %7 = arith.addf %3, %6 : vector<32x256xf32>
    %c0_6 = arith.constant 0 : index
    %c0_7 = arith.constant 0 : index
    %8 = vector.load %arg7[%c0_6, %c0_7] : memref<32x256xf32, #tpu.memory_space<vmem>>, vector<32x256xf32>
    tpu.vector_store %arg7[%c0_6, %c0_7], %7 {strides = array<i32>} : memref<32x256xf32, #tpu.memory_space<vmem>>, vector<32x256xf32>,
    %c0_i32_8 = arith.constant 0 : i32
    %9 = arith.cmpi eq, %arg2, %c0_i32_8 : i32
    %10 = arith.extui %9 : i1 to i32
    %c0_i32_9 = arith.constant 0 : i32
    %11 = arith.cmpi ne, %10, %c0_i32_9 : i32
    scf.if %11 {
      %c0_10 = arith.constant 0 : index
      %c0_11 = arith.constant 0 : index
      %12 = vector.load %arg7[%c0_10, %c0_11] : memref<32x256xf32, #tpu.memory_space<vmem>>, vector<32x256xf32>
      %c0_12 = arith.constant 0 : index
      %c0_13 = arith.constant 0 : index
      %13 = vector.load %arg5[%c0_12, %c0_13] : memref<1x256xf32, #tpu.memory_space<vmem>>, vector<1x256xf32>
      %14 = vector.broadcast %13 : vector<1x256xf32> to vector<32x256xf32>
      %15 = arith.addf %12, %14 : vector<32x256xf32>
      %c0_14 = arith.constant 0 : index
      %c0_15 = arith.constant 0 : index
      %16 = vector.load %arg6[%c0_14, %c0_15] : memref<32x256xf32, #tpu.memory_space<vmem>>, vector<32x256xf32>
      tpu.vector_store %arg6[%c0_14, %c0_15], %15 {strides = array<i32>} : memref<32x256xf32, #tpu.memory_space<vmem>>, vector<32x256xf32>,
    } else {
    }
    return
  }
  func.func @transform_0(%arg0: i32, %arg1: i32, %arg2: i32) -> (i32, i32) {
    %c0_i32 = arith.constant 0 : i32
    return %arg0, %arg2 : i32, i32
  }
  func.func @transform_1(%arg0: i32, %arg1: i32, %arg2: i32) -> (i32, i32) {
    %c0_i32 = arith.constant 0 : i32
    return %arg2, %arg1 : i32, i32
  }
  func.func @transform_2(%arg0: i32, %arg1: i32, %arg2: i32) -> (i32, i32) {
    %c0_i32 = arith.constant 0 : i32
    %c0_i32_0 = arith.constant 0 : i32
    return %c0_i32, %arg1 : i32, i32
  }
  func.func @transform_3(%arg0: i32, %arg1: i32, %arg2: i32) -> (i32, i32) {
    %c0_i32 = arith.constant 0 : i32
    return %arg0, %arg1 : i32, i32
  }
}

module attributes {stable_mosaic.version = 11 : i64} {
  func.func @_matmul_kernel(%arg0: i32, %arg1: i32, %arg2: i32, %arg3: memref<32x256xbf16, #tpu.memory_space<vmem>>, %arg4: memref<256x32xbf16, #tpu.memory_space<vmem>>, %arg5: memref<1x32xf32, #tpu.memory_space<vmem>>, %arg6: memref<32x32xf32, #tpu.memory_space<vmem>>, %arg7: memref<32x32xf32, #tpu.memory_space<vmem>>) attributes {dimension_semantics = [#tpu.dimension_semantics<parallel>, #tpu.dimension_semantics<parallel>, #tpu.dimension_semantics<arbitrary>], iteration_bounds = array<i64: 1, 1, 1>, scalar_prefetch = 0 : i64, scratch_operands = 1 : i64, tpu.core_type = #tpu.core_type<tc>, window_params = [{transform_indices = @transform_0, window_bounds = array<i64: 32, 256>}, {transform_indices = @transform_1, window_bounds = array<i64: 256, 32>}, {transform_indices = @transform_2, window_bounds = array<i64: 1, 32>}, {transform_indices = @transform_3, window_bounds = array<i64: 32, 32>}]} {
    %c0_i32 = arith.constant 0 : i32
    %0 = arith.cmpi eq, %arg2, %c0_i32 : i32
    %1 = arith.extui %0 : i1 to i32
    %c0_i32_0 = arith.constant 0 : i32
    %2 = arith.cmpi ne, %1, %c0_i32_0 : i32
    scf.if %2 {
      %cst_10 = arith.constant 0.000000e+00 : f32
      %12 = vector.broadcast %cst_10 : f32 to vector<32x32xf32>
      %c0_11 = arith.constant 0 : index
      %c0_12 = arith.constant 0 : index
      %13 = vector.load %arg7[%c0_11, %c0_12] : memref<32x32xf32, #tpu.memory_space<vmem>>, vector<32x32xf32>
      tpu.vector_store %arg7[%c0_11, %c0_12], %12 {strides = array<i32>} : memref<32x32xf32, #tpu.memory_space<vmem>>, vector<32x32xf32>,
    } else {
    }
    %c0 = arith.constant 0 : index
    %c0_1 = arith.constant 0 : index
    %3 = vector.load %arg7[%c0, %c0_1] : memref<32x32xf32, #tpu.memory_space<vmem>>, vector<32x32xf32>
    %c0_2 = arith.constant 0 : index
    %c0_3 = arith.constant 0 : index
    %4 = vector.load %arg3[%c0_2, %c0_3] : memref<32x256xbf16, #tpu.memory_space<vmem>>, vector<32x256xbf16>
    %c0_4 = arith.constant 0 : index
    %c0_5 = arith.constant 0 : index
    %5 = vector.load %arg4[%c0_4, %c0_5] : memref<256x32xbf16, #tpu.memory_space<vmem>>, vector<256x32xbf16>
    %cst = arith.constant dense<0.000000e+00> : vector<32x32xf32>
    %6 = tpu.matmul %4, %5, %cst {dimension_numbers = #tpu.dot_dimension_numbers<[1], [0], [0], [1], [0, 0, 1, 1], [], []>} : vector<32x256xbf16>, vector<256x32xbf16>, vector<32x32xf32> -> vector<32x32xf32>
    %7 = arith.addf %3, %6 : vector<32x32xf32>
    %c0_6 = arith.constant 0 : index
    %c0_7 = arith.constant 0 : index
    %8 = vector.load %arg7[%c0_6, %c0_7] : memref<32x32xf32, #tpu.memory_space<vmem>>, vector<32x32xf32>
    tpu.vector_store %arg7[%c0_6, %c0_7], %7 {strides = array<i32>} : memref<32x32xf32, #tpu.memory_space<vmem>>, vector<32x32xf32>,
    %c0_i32_8 = arith.constant 0 : i32
    %9 = arith.cmpi eq, %arg2, %c0_i32_8 : i32
    %10 = arith.extui %9 : i1 to i32
    %c0_i32_9 = arith.constant 0 : i32
    %11 = arith.cmpi ne, %10, %c0_i32_9 : i32
    scf.if %11 {
      %c0_10 = arith.constant 0 : index
      %c0_11 = arith.constant 0 : index
      %12 = vector.load %arg7[%c0_10, %c0_11] : memref<32x32xf32, #tpu.memory_space<vmem>>, vector<32x32xf32>
      %c0_12 = arith.constant 0 : index
      %c0_13 = arith.constant 0 : index
      %13 = vector.load %arg5[%c0_12, %c0_13] : memref<1x32xf32, #tpu.memory_space<vmem>>, vector<1x32xf32>
      %14 = vector.broadcast %13 : vector<1x32xf32> to vector<32x32xf32>
      %15 = arith.addf %12, %14 : vector<32x32xf32>
      %c0_14 = arith.constant 0 : index
      %c0_15 = arith.constant 0 : index
      %16 = vector.load %arg6[%c0_14, %c0_15] : memref<32x32xf32, #tpu.memory_space<vmem>>, vector<32x32xf32>
      tpu.vector_store %arg6[%c0_14, %c0_15], %15 {strides = array<i32>} : memref<32x32xf32, #tpu.memory_space<vmem>>, vector<32x32xf32>,
    } else {
    }
    return
  }
  func.func @transform_0(%arg0: i32, %arg1: i32, %arg2: i32) -> (i32, i32) {
    %c0_i32 = arith.constant 0 : i32
    return %arg0, %arg2 : i32, i32
  }
  func.func @transform_1(%arg0: i32, %arg1: i32, %arg2: i32) -> (i32, i32) {
    %c0_i32 = arith.constant 0 : i32
    return %arg2, %arg1 : i32, i32
  }
  func.func @transform_2(%arg0: i32, %arg1: i32, %arg2: i32) -> (i32, i32) {
    %c0_i32 = arith.constant 0 : i32
    %c0_i32_0 = arith.constant 0 : i32
    return %c0_i32, %arg1 : i32, i32
  }
  func.func @transform_3(%arg0: i32, %arg1: i32, %arg2: i32) -> (i32, i32) {
    %c0_i32 = arith.constant 0 : i32
    return %arg0, %arg1 : i32, i32
  }
}

</mosaic_0001>

<bundles_post_ra>
// kernel: forward.2
= control target key start
LH: loop header
LB: loop body
LE: loop exit
PB: predicated region body
PF: predicated region fallthrough
CT: control target
= control target key end

     0   :  { %s2982_s1 = inlined_call_operand.vmem [shape: bf16[1536,256], index: 1, kind: input, shape index: {}]   ;;  %s2983_s0 = inlined_call_operand.vmem [shape: bf16[32,1536], index: 0, kind: input, shape index: {}]   ;;  %s2984_s2 = inlined_call_operand.vmem [shape: f32[1,256], index: 2, kind: input, shape index: {}]   ;;  %s2985_s3 = inlined_call_operand.vmem [shape: f32[32,256], index: 3, kind: output, shape index: {}]  }
   0x1   :  { %v1963_v0 = vld [vmem:[%s2982_s1 + $0x4] ss:$8 sps:$4 sm:$0xff]   ;;  %v1967_v2 = vld [vmem:[%s2982_s1] ss:$8 sps:$4 sm:$0xff]   ;;  %v1969_v4 = vld [vmem:[%s2982_s1 + $0x14] ss:$8 sps:$4 sm:$0xff]  }
   0x2   :  { %v1965_v1 = vld [vmem:[%s2982_s1 + $0x304] ss:$8 sps:$4 sm:$0xff]   ;;  %1330 = vmatprep.subr.bf16.mxu1 %v1963_v0  ;;  %v1968_v3 = vld [vmem:[%s2982_s1 + $0x300] ss:$8 sps:$4 sm:$0xff]   ;;  %v1971_v5 = vld [vmem:[%s2982_s1 + $0x314] ss:$8 sps:$4 sm:$0xff]  }
   0x3   :  { %1489 = vmatprep.subr.bf16.mxu0 %v1965_v1  ;;  %1331 = vmatpush1.bf16.msra.mxu1 %v1967_v2  ;;  %v1973_v6 = vld [vmem:[%s2982_s1 + $0x10] ss:$8 sps:$4 sm:$0xff]   ;;  %v1975_v8 = vld [vmem:[%s2982_s1 + $0x24] ss:$8 sps:$4 sm:$0xff]   ;;  %v1979_v10 = vld [vmem:[%s2982_s1 + $0x20] ss:$8 sps:$4 sm:$0xff]  }
   0x4   :  { %1490 = vmatpush1.bf16.msra.mxu0 %v1968_v3  ;;  %1332 = vmatprep.subr.bf16.mxu1 %v1969_v4  ;;  %v1974_v7 = vld [vmem:[%s2982_s1 + $0x310] ss:$8 sps:$4 sm:$0xff]   ;;  %v1977_v9 = vld [vmem:[%s2982_s1 + $0x324] ss:$8 sps:$4 sm:$0xff]   ;;  %v1980_v11 = vld [vmem:[%s2982_s1 + $0x320] ss:$8 sps:$4 sm:$0xff]  }
   0x5   :  { %1491 = vmatprep.subr.bf16.mxu0 %v1971_v5  ;;  %v1981_v12 = vld [vmem:[%s2982_s1 + $0x34] ss:$8 sps:$4 sm:$0xff]   ;;  %v1985_v14 = vld [vmem:[%s2982_s1 + $0x30] ss:$8 sps:$4 sm:$0xff]   ;;  %v1987_v16 = vld [vmem:[%s2982_s1 + $0x44] ss:$8 sps:$4 sm:$0xff]  }
   0x6   :  { %v1983_v13 = vld [vmem:[%s2982_s1 + $0x334] ss:$8 sps:$4 sm:$0xff]   ;;  %v1986_v15 = vld [vmem:[%s2982_s1 + $0x330] ss:$8 sps:$4 sm:$0xff]   ;;  %v1989_v17 = vld [vmem:[%s2982_s1 + $0x344] ss:$8 sps:$4 sm:$0xff]  }
   0x7   :  { %1333 = vmatpush1.bf16.msra.mxu1 %v1973_v6  ;;  %v1991_v18 = vld [vmem:[%s2982_s1 + $0x40] ss:$8 sps:$4 sm:$0xff]   ;;  %v1993_v20 = vld [vmem:[%s2982_s1 + $0x54] ss:$8 sps:$4 sm:$0xff]   ;;  %v1997_v22 = vld [vmem:[%s2982_s1 + $0x50] ss:$8 sps:$4 sm:$0xff]  }
   0x8   :  { %1492 = vmatpush1.bf16.msra.mxu0 %v1974_v7  ;;  %1334 = vmatprep.subr.bf16.mxu1 %v1975_v8  ;;  %v1992_v19 = vld [vmem:[%s2982_s1 + $0x340] ss:$8 sps:$4 sm:$0xff]   ;;  %v1995_v21 = vld [vmem:[%s2982_s1 + $0x354] ss:$8 sps:$4 sm:$0xff]   ;;  %v1998_v23 = vld [vmem:[%s2982_s1 + $0x350] ss:$8 sps:$4 sm:$0xff]  }
   0x9   :  { %1493 = vmatprep.subr.bf16.mxu0 %v1977_v9  ;;  %v1999_v24 = vld [vmem:[%s2982_s1 + $0x64] ss:$8 sps:$4 sm:$0xff]   ;;  %v2003_v26 = vld [vmem:[%s2982_s1 + $0x60] ss:$8 sps:$4 sm:$0xff]   ;;  %v2005_v28 = vld [vmem:[%s2982_s1 + $0x74] ss:$8 sps:$4 sm:$0xff]  }
   0xa   :  { %v2001_v25 = vld [vmem:[%s2982_s1 + $0x364] ss:$8 sps:$4 sm:$0xff]   ;;  %v2004_v27 = vld [vmem:[%s2982_s1 + $0x360] ss:$8 sps:$4 sm:$0xff]   ;;  %v2007_v29 = vld [vmem:[%s2982_s1 + $0x374] ss:$8 sps:$4 sm:$0xff]  }
   0xb   :  { %1335 = vmatpush1.bf16.msra.mxu1 %v1979_v10  ;;  %v2009_v30 = vld [vmem:[%s2982_s1 + $0x70] ss:$8 sps:$4 sm:$0xff]   ;;  %v2011_v32 = vld [vmem:[%s2982_s1 + $0x84] ss:$8 sps:$4 sm:$0xff]   ;;  %v2015_v34 = vld [vmem:[%s2982_s1 + $0x80] ss:$8 sps:$4 sm:$0xff]  }
   0xc   :  { %1494 = vmatpush1.bf16.msra.mxu0 %v1980_v11  ;;  %1336 = vmatprep.subr.bf16.mxu1 %v1981_v12  ;;  %v2010_v31 = vld [vmem:[%s2982_s1 + $0x370] ss:$8 sps:$4 sm:$0xff]   ;;  %v2013_v33 = vld [vmem:[%s2982_s1 + $0x384] ss:$8 sps:$4 sm:$0xff]   ;;  %v2016_v35 = vld [vmem:[%s2982_s1 + $0x380] ss:$8 sps:$4 sm:$0xff]  }
   0xd   :  { %1495 = vmatprep.subr.bf16.mxu0 %v1983_v13  ;;  %v2017_v36 = vld [vmem:[%s2982_s1 + $0x94] ss:$8 sps:$4 sm:$0xff]   ;;  %v2021_v38 = vld [vmem:[%s2982_s1 + $0x90] ss:$8 sps:$4 sm:$0xff]   ;;  %v2023_v40 = vld [vmem:[%s2982_s1 + $0xa4] ss:$8 sps:$4 sm:$0xff]  }
   0xe   :  { %v2019_v37 = vld [vmem:[%s2982_s1 + $0x394] ss:$8 sps:$4 sm:$0xff]   ;;  %v2022_v39 = vld [vmem:[%s2982_s1 + $0x390] ss:$8 sps:$4 sm:$0xff]   ;;  %v2025_v41 = vld [vmem:[%s2982_s1 + $0x3a4] ss:$8 sps:$4 sm:$0xff]  }
   0xf   :  { %1337 = vmatpush1.bf16.msra.mxu1 %v1985_v14  ;;  %v2027_v42 = vld [vmem:[%s2982_s1 + $0xa0] ss:$8 sps:$4 sm:$0xff]   ;;  %v2029_v44 = vld [vmem:[%s2982_s1 + $0xb4] ss:$8 sps:$4 sm:$0xff]   ;;  %v2033_v46 = vld [vmem:[%s2982_s1 + $0xb0] ss:$8 sps:$4 sm:$0xff]  }
  0x10   :  { %1496 = vmatpush1.bf16.msra.mxu0 %v1986_v15  ;;  %1338 = vmatprep.subr.bf16.mxu1 %v1987_v16  ;;  %v2028_v43 = vld [vmem:[%s2982_s1 + $0x3a0] ss:$8 sps:$4 sm:$0xff]   ;;  %v2031_v45 = vld [vmem:[%s2982_s1 + $0x3b4] ss:$8 sps:$4 sm:$0xff]   ;;  %v2034_v47 = vld [vmem:[%s2982_s1 + $0x3b0] ss:$8 sps:$4 sm:$0xff]  }
  0x11   :  { %1497 = vmatprep.subr.bf16.mxu0 %v1989_v17  ;;  %v2061_v48 = vld [vmem:[%s2983_s0 + $0x4] ss:$48 sps:$4 sm:$0xff]   ;;  %v2067_v51 = vld [vmem:[%s2983_s0 + $0x1c] ss:$48 sps:$4 sm:$0xff]   ;;  %v2039_v52 = vld [vmem:[%s2982_s1 + $0xc0] ss:$8 sps:$4 sm:$0xff]  }
  0x12   :  { %v2035_v49 = vld [vmem:[%s2982_s1 + $0xc4] ss:$8 sps:$4 sm:$0xff]   ;;  %1362 = vmatprep.mubr.bf16.mxu1 %v2061_v48  ;;  %v2040_v53 = vld [vmem:[%s2982_s1 + $0x3c0] ss:$8 sps:$4 sm:$0xff]   ;;  %v2041_v54 = vld [vmem:[%s2982_s1 + $0xd4] ss:$8 sps:$4 sm:$0xff]   ;;  %1521 = vmatprep.mubr.bf16.mxu0 %v2067_v51 }
  0x13   :  { %1339 = vmatpush1.bf16.msra.mxu1 %v1991_v18  ;;  %v2037_v50 = vld [vmem:[%s2982_s1 + $0x3c4] ss:$8 sps:$4 sm:$0xff]   ;;  %v2043_v55 = vld [vmem:[%s2982_s1 + $0x3d4] ss:$8 sps:$4 sm:$0xff]   ;;  %v2045_v56 = vld [vmem:[%s2982_s1 + $0xd0] ss:$8 sps:$4 sm:$0xff]  }
  0x14   :  { %1498 = vmatpush1.bf16.msra.mxu0 %v1992_v19  ;;  %1340 = vmatprep.subr.bf16.mxu1 %v1993_v20  ;;  %v2046_v57 = vld [vmem:[%s2982_s1 + $0x3d0] ss:$8 sps:$4 sm:$0xff]   ;;  %v2047_v58 = vld [vmem:[%s2982_s1 + $0xe4] ss:$8 sps:$4 sm:$0xff]   ;;  %v2051_v60 = vld [vmem:[%s2982_s1 + $0xe0] ss:$8 sps:$4 sm:$0xff]  }
  0x15   :  { %1499 = vmatprep.subr.bf16.mxu0 %v1995_v21  ;;  %v2049_v59 = vld [vmem:[%s2982_s1 + $0x3e4] ss:$8 sps:$4 sm:$0xff]   ;;  %v2052_v61 = vld [vmem:[%s2982_s1 + $0x3e0] ss:$8 sps:$4 sm:$0xff]   ;;  %v2053_v62 = vld [vmem:[%s2982_s1 + $0xf4] ss:$8 sps:$4 sm:$0xff]  }
  0x16   :  { %v2055_v63 = vld [vmem:[%s2982_s1 + $0x3f4] ss:$8 sps:$4 sm:$0xff]   ;;  %v2057_v0 = vld [vmem:[%s2982_s1 + $0xf0] ss:$8 sps:$4 sm:$0xff]   ;;  %v2064_v2 = vld [vmem:[%s2982_s1 + $0x104] ss:$8 sps:$4 sm:$0xff]  }
  0x17   :  { %1341 = vmatpush1.bf16.msra.mxu1 %v1997_v22  ;;  %v2058_v1 = vld [vmem:[%s2982_s1 + $0x3f0] ss:$8 sps:$4 sm:$0xff]   ;;  %v2070_v3 = vld [vmem:[%s2982_s1 + $0x404] ss:$8 sps:$4 sm:$0xff]   ;;  %v2062_v5 = vld [vmem:[%s2982_s1 + $0x100] ss:$8 sps:$4 sm:$0xff]  }
  0x18   :  { %1500 = vmatpush1.bf16.msra.mxu0 %v1998_v23  ;;  %1342 = vmatprep.subr.bf16.mxu1 %v1999_v24  ;;  %v2059_v4 = vld [vmem:[%s2983_s0] ss:$48 sps:$4 sm:$0xff]   ;;  %v2065_v6 = vld [vmem:[%s2983_s0 + $0x18] ss:$48 sps:$4 sm:$0xff]   ;;  %v2073_v8 = vld [vmem:[%s2982_s1 + $0x114] ss:$8 sps:$4 sm:$0xff]  }
  0x19   :  { %1501 = vmatprep.subr.bf16.mxu0 %v2001_v25  ;;  %v2068_v7 = vld [vmem:[%s2982_s1 + $0x400] ss:$8 sps:$4 sm:$0xff]   ;;  %v2076_v9 = vld [vmem:[%s2982_s1 + $0x414] ss:$8 sps:$4 sm:$0xff]   ;;  %v2071_v10 = vld [vmem:[%s2982_s1 + $0x110] ss:$8 sps:$4 sm:$0xff]  }
  0x1a   :  { %v2074_v11 = vld [vmem:[%s2982_s1 + $0x410] ss:$8 sps:$4 sm:$0xff]   ;;  %v2079_v12 = vld [vmem:[%s2982_s1 + $0x124] ss:$8 sps:$4 sm:$0xff]   ;;  %v2077_v14 = vld [vmem:[%s2982_s1 + $0x120] ss:$8 sps:$4 sm:$0xff]  }
  0x1b   :  { %1343 = vmatpush1.bf16.msra.mxu1 %v2003_v26  ;;  %v2082_v13 = vld [vmem:[%s2982_s1 + $0x424] ss:$8 sps:$4 sm:$0xff]   ;;  %v2080_v15 = vld [vmem:[%s2982_s1 + $0x420] ss:$8 sps:$4 sm:$0xff]   ;;  %v2085_v16 = vld [vmem:[%s2982_s1 + $0x134] ss:$8 sps:$4 sm:$0xff]  }
  0x1c   :  { %1502 = vmatpush1.bf16.msra.mxu0 %v2004_v27  ;;  %1344 = vmatprep.subr.bf16.mxu1 %v2005_v28  ;;  %v2088_v17 = vld [vmem:[%s2982_s1 + $0x434] ss:$8 sps:$4 sm:$0xff]   ;;  %v2083_v18 = vld [vmem:[%s2982_s1 + $0x130] ss:$8 sps:$4 sm:$0xff]   ;;  %v2091_v20 = vld [vmem:[%s2982_s1 + $0x144] ss:$8 sps:$4 sm:$0xff]  }
  0x1d   :  { %1503 = vmatprep.subr.bf16.mxu0 %v2007_v29  ;;  %v2086_v19 = vld [vmem:[%s2982_s1 + $0x430] ss:$8 sps:$4 sm:$0xff]   ;;  %v2094_v21 = vld [vmem:[%s2982_s1 + $0x444] ss:$8 sps:$4 sm:$0xff]   ;;  %v2089_v22 = vld [vmem:[%s2982_s1 + $0x140] ss:$8 sps:$4 sm:$0xff]  }
  0x1e   :  { %v2092_v23 = vld [vmem:[%s2982_s1 + $0x440] ss:$8 sps:$4 sm:$0xff]   ;;  %v2097_v24 = vld [vmem:[%s2982_s1 + $0x154] ss:$8 sps:$4 sm:$0xff]   ;;  %v2095_v26 = vld [vmem:[%s2982_s1 + $0x150] ss:$8 sps:$4 sm:$0xff]  }
  0x1f   :  { %1345 = vmatpush1.bf16.msra.mxu1 %v2009_v30  ;;  %v2100_v25 = vld [vmem:[%s2982_s1 + $0x454] ss:$8 sps:$4 sm:$0xff]   ;;  %v2098_v27 = vld [vmem:[%s2982_s1 + $0x450] ss:$8 sps:$4 sm:$0xff]   ;;  %v2103_v29 = vld [vmem:[%s2982_s1 + $0x164] ss:$8 sps:$4 sm:$0xff]  }
  0x20   :  { %1504 = vmatpush1.bf16.msra.mxu0 %v2010_v31  ;;  %1346 = vmatprep.subr.bf16.mxu1 %v2011_v32  ;;  %v2149_v28 = vld [vmem:[%s2983_s0 + $0x64] ss:$48 sps:$4 sm:$0xff]   ;;  %v2154_v31 = vld [vmem:[%s2983_s0 + $0x7c] ss:$48 sps:$4 sm:$0xff]   ;;  %v2101_v32 = vld [vmem:[%s2982_s1 + $0x160] ss:$8 sps:$4 sm:$0xff]  }
  0x21   :  { %1505 = vmatprep.subr.bf16.mxu0 %v2013_v33  ;;  %v2106_v30 = vld [vmem:[%s2982_s1 + $0x464] ss:$8 sps:$4 sm:$0xff]   ;;  %v2104_v33 = vld [vmem:[%s2982_s1 + $0x460] ss:$8 sps:$4 sm:$0xff]   ;;  %v2119_v48 = vld [vmem:[%s2982_s1 + $0x190] ss:$8 sps:$4 sm:$0xff]  }
  0x22   :  { %v2130_v51 = vld [vmem:[%s2982_s1 + $0x4a4] ss:$8 sps:$4 sm:$0xff]  }
  0x23   :  { %1347 = vmatpush1.bf16.msra.mxu1 %v2015_v34  ;;  %v2159_v34 = vld [vmem:[%s2983_s0 + $0x60] ss:$48 sps:$4 sm:$0xff]  }
  0x24   :  { %1506 = vmatpush1.bf16.msra.mxu0 %v2016_v35  ;;  %1348 = vmatprep.subr.bf16.mxu1 %v2017_v36  ;;  %v2160_v35 = vld [vmem:[%s2983_s0 + $0x78] ss:$48 sps:$4 sm:$0xff]   ;;  %v2109_v36 = vld [vmem:[%s2982_s1 + $0x174] ss:$8 sps:$4 sm:$0xff]  }
  0x25   :  { %1507 = vmatprep.subr.bf16.mxu0 %v2019_v37  ;;  %v2112_v37 = vld [vmem:[%s2982_s1 + $0x474] ss:$8 sps:$4 sm:$0xff]  }
  0x27   :  { %1349 = vmatpush1.bf16.msra.mxu1 %v2021_v38  ;;  %v2107_v38 = vld [vmem:[%s2982_s1 + $0x170] ss:$8 sps:$4 sm:$0xff]  }
  0x28   :  { %1508 = vmatpush1.bf16.msra.mxu0 %v2022_v39  ;;  %1350 = vmatprep.subr.bf16.mxu1 %v2023_v40  ;;  %v2110_v39 = vld [vmem:[%s2982_s1 + $0x470] ss:$8 sps:$4 sm:$0xff]   ;;  %v2169_v40 = vld [vmem:[%s2983_s0 + $0xc] ss:$48 sps:$4 sm:$0xff]  }
  0x29   :  { %1509 = vmatprep.subr.bf16.mxu0 %v2025_v41  ;;  %v2115_v41 = vld [vmem:[%s2982_s1 + $0x184] ss:$8 sps:$4 sm:$0xff]  }
  0x2b   :  { %1351 = vmatpush1.bf16.msra.mxu1 %v2027_v42  ;;  %v2118_v42 = vld [vmem:[%s2982_s1 + $0x484] ss:$8 sps:$4 sm:$0xff]  }
  0x2c   :  { %1510 = vmatpush1.bf16.msra.mxu0 %v2028_v43  ;;  %1352 = vmatprep.subr.bf16.mxu1 %v2029_v44  ;;  %v2175_v43 = vld [vmem:[%s2983_s0 + $0x24] ss:$48 sps:$4 sm:$0xff]   ;;  %v2113_v44 = vld [vmem:[%s2982_s1 + $0x180] ss:$8 sps:$4 sm:$0xff]  }
  0x2d   :  { %1511 = vmatprep.subr.bf16.mxu0 %v2031_v45  ;;  %v2116_v45 = vld [vmem:[%s2982_s1 + $0x480] ss:$8 sps:$4 sm:$0xff]  }
  0x2f   :  { %1353 = vmatpush1.bf16.msra.mxu1 %v2033_v46  ;;  %v2121_v46 = vld [vmem:[%s2982_s1 + $0x194] ss:$8 sps:$4 sm:$0xff]  }
  0x30   :  { %1512 = vmatpush1.bf16.msra.mxu0 %v2034_v47  ;;  %1354 = vmatprep.subr.bf16.mxu1 %v2035_v49  ;;  %v2124_v47 = vld [vmem:[%s2982_s1 + $0x494] ss:$8 sps:$4 sm:$0xff]   ;;  %v2122_v49 = vld [vmem:[%s2982_s1 + $0x490] ss:$8 sps:$4 sm:$0xff]  }
  0x31   :  { %1513 = vmatprep.subr.bf16.mxu0 %v2037_v50  ;;  %v2127_v50 = vld [vmem:[%s2982_s1 + $0x1a4] ss:$8 sps:$4 sm:$0xff]  }
  0x33   :  { %1355 = vmatpush1.bf16.msra.mxu1 %v2039_v52  ;;  %v2125_v52 = vld [vmem:[%s2982_s1 + $0x1a0] ss:$8 sps:$4 sm:$0xff]  }
  0x34   :  { %1514 = vmatpush1.bf16.msra.mxu0 %v2040_v53  ;;  %1356 = vmatprep.subr.bf16.mxu1 %v2041_v54  ;;  %v2128_v53 = vld [vmem:[%s2982_s1 + $0x4a0] ss:$8 sps:$4 sm:$0xff]   ;;  %v2133_v54 = vld [vmem:[%s2982_s1 + $0x1b4] ss:$8 sps:$4 sm:$0xff]  }
  0x35   :  { %1515 = vmatprep.subr.bf16.mxu0 %v2043_v55  ;;  %v2136_v55 = vld [vmem:[%s2982_s1 + $0x4b4] ss:$8 sps:$4 sm:$0xff]  }
  0x37   :  { %1357 = vmatpush1.bf16.msra.mxu1 %v2045_v56  ;;  %v2131_v56 = vld [vmem:[%s2982_s1 + $0x1b0] ss:$8 sps:$4 sm:$0xff]  }
  0x38   :  { %1516 = vmatpush1.bf16.msra.mxu0 %v2046_v57  ;;  %1358 = vmatprep.subr.bf16.mxu1 %v2047_v58  ;;  %v2134_v57 = vld [vmem:[%s2982_s1 + $0x4b0] ss:$8 sps:$4 sm:$0xff]   ;;  %v2139_v58 = vld [vmem:[%s2982_s1 + $0x1c4] ss:$8 sps:$4 sm:$0xff]  }
  0x39   :  { %1517 = vmatprep.subr.bf16.mxu0 %v2049_v59  ;;  %v2142_v59 = vld [vmem:[%s2982_s1 + $0x4c4] ss:$8 sps:$4 sm:$0xff]  }
  0x3b   :  { %1359 = vmatpush1.bf16.msra.mxu1 %v2051_v60  ;;  %v2137_v60 = vld [vmem:[%s2982_s1 + $0x1c0] ss:$8 sps:$4 sm:$0xff]  }
  0x3c   :  { %1518 = vmatpush1.bf16.msra.mxu0 %v2052_v61  ;;  %1360 = vmatprep.subr.bf16.mxu1 %v2053_v62  ;;  %v2140_v61 = vld [vmem:[%s2982_s1 + $0x4c0] ss:$8 sps:$4 sm:$0xff]   ;;  %v2145_v62 = vld [vmem:[%s2982_s1 + $0x1d4] ss:$8 sps:$4 sm:$0xff]  }
  0x3d   :  { %1519 = vmatprep.subr.bf16.mxu0 %v2055_v63  ;;  %v2148_v63 = vld [vmem:[%s2982_s1 + $0x4d4] ss:$8 sps:$4 sm:$0xff]  }
  0x3f   :  { %1361 = vmatpush1.bf16.msra.mxu1 %v2057_v0  ;;  %v2143_v0 = vld [vmem:[%s2982_s1 + $0x1d0] ss:$8 sps:$4 sm:$0xff]  }
  0x40   :  { %1520 = vmatpush1.bf16.msra.mxu0 %v2058_v1  ;;  %1383 = vmatprep.subr.bf16.mxu1 %v2064_v2  ;;  %v2146_v1 = vld [vmem:[%s2982_s1 + $0x4d0] ss:$8 sps:$4 sm:$0xff]   ;;  %v2153_v2 = vld [vmem:[%s2982_s1 + $0x1e4] ss:$8 sps:$4 sm:$0xff]  }
  0x41   :  { %1542 = vmatprep.subr.bf16.mxu0 %v2070_v3  ;;  %v2158_v3 = vld [vmem:[%s2982_s1 + $0x4e4] ss:$8 sps:$4 sm:$0xff]  }
  0x42   :  { %1363 = vmatmul.mubr.bf16.vlgmr.msra.gmra.mrb[0].mxu1 %v2059_v4  ;;  %v2151_v4 = vld [vmem:[%s2982_s1 + $0x1e0] ss:$8 sps:$4 sm:$0xff]  }
  0x43   :  { %1522 = vmatmul.mubr.bf16.vlgmr.msra.gmra.mrb[0].mxu0 %v2065_v6  ;;  %1384 = vmatpush1.bf16.msra.mxu1 %v2062_v5  ;;  %v2156_v5 = vld [vmem:[%s2982_s1 + $0x4e0] ss:$8 sps:$4 sm:$0xff]   ;;  %v2163_v6 = vld [vmem:[%s2982_s1 + $0x1f4] ss:$8 sps:$4 sm:$0xff]  }
  0x44   :  { %1543 = vmatpush1.bf16.msra.mxu0 %v2068_v7  ;;  %1385 = vmatprep.subr.bf16.mxu1 %v2073_v8  ;;  %v2166_v7 = vld [vmem:[%s2982_s1 + $0x4f4] ss:$8 sps:$4 sm:$0xff]   ;;  %v2161_v8 = vld [vmem:[%s2982_s1 + $0x1f0] ss:$8 sps:$4 sm:$0xff]  }
  0x45   :  { %1544 = vmatprep.subr.bf16.mxu0 %v2076_v9  ;;  %1372 = vmatprep.mubr.bf16.mxu1 %v2149_v28  ;;  %v2164_v9 = vld [vmem:[%s2982_s1 + $0x4f0] ss:$8 sps:$4 sm:$0xff]   ;;  %v2193_v28 = vld [vmem:[%s2982_s1 + $0x234] ss:$8 sps:$4 sm:$0xff]  }
  0x46   :  { %1531 = vmatprep.mubr.bf16.mxu0 %v2154_v31  ;;  %v2194_v31 = vld [vmem:[%s2982_s1 + $0x530] ss:$8 sps:$4 sm:$0xff]  }
  0x47   :  { %1386 = vmatpush1.bf16.msra.mxu1 %v2071_v10  ;;  %v2172_v10 = vld [vmem:[%s2982_s1 + $0x204] ss:$8 sps:$4 sm:$0xff]  }
  0x48   :  { %1545 = vmatpush1.bf16.msra.mxu0 %v2074_v11  ;;  %1387 = vmatprep.subr.bf16.mxu1 %v2079_v12  ;;  %v2178_v11 = vld [vmem:[%s2982_s1 + $0x504] ss:$8 sps:$4 sm:$0xff]   ;;  %v2167_v12 = vld [vmem:[%s2983_s0 + $0x8] ss:$48 sps:$4 sm:$0xff]  }
  0x49   :  { %1546 = vmatprep.subr.bf16.mxu0 %v2082_v13  ;;  %v2170_v13 = vld [vmem:[%s2982_s1 + $0x200] ss:$8 sps:$4 sm:$0xff]  }
  0x4a   :  { %1373 = vmatmul.mubr.bf16.gmra.mrb[4].mxu1 %v2159_v34  ;;  %v2202_v34 = vld [vmem:[%s2982_s1 + $0x544] ss:$8 sps:$4 sm:$0xff]  }
  0x4b   :  { %1388 = vmatpush1.bf16.msra.mxu1 %v2077_v14  ;;  %1532 = vmatmul.mubr.bf16.gmra.mrb[4].mxu0 %v2160_v35  ;;  %v2173_v14 = vld [vmem:[%s2983_s0 + $0x20] ss:$48 sps:$4 sm:$0xff]   ;;  %v2280_v35 = vld [vmem:[%s2983_s0 + $0x2c] ss:$48 sps:$4 sm:$0xff]  }
  0x4c   :  { %1547 = vmatpush1.bf16.msra.mxu0 %v2080_v15  ;;  %1389 = vmatprep.subr.bf16.mxu1 %v2085_v16  ;;  %v2176_v15 = vld [vmem:[%s2982_s1 + $0x500] ss:$8 sps:$4 sm:$0xff]   ;;  %v2181_v16 = vld [vmem:[%s2982_s1 + $0x214] ss:$8 sps:$4 sm:$0xff]  }
  0x4d   :  { %1548 = vmatprep.subr.bf16.mxu0 %v2088_v17  ;;  %1415 = vmatprep.mubr.bf16.mxu1 %v2169_v40  ;;  %v2184_v17 = vld [vmem:[%s2982_s1 + $0x514] ss:$8 sps:$4 sm:$0xff]   ;;  %v2203_v40 = vld [vmem:[%s2982_s1 + $0x250] ss:$8 sps:$4 sm:$0xff]  }
  0x4e   :  { %1574 = vmatprep.mubr.bf16.mxu0 %v2175_v43  ;;  %v2214_v43 = vld [vmem:[%s2982_s1 + $0x564] ss:$8 sps:$4 sm:$0xff]  }
  0x4f   :  { %1390 = vmatpush1.bf16.msra.mxu1 %v2083_v18  ;;  %v2179_v18 = vld [vmem:[%s2982_s1 + $0x210] ss:$8 sps:$4 sm:$0xff]  }
  0x50   :  { %1549 = vmatpush1.bf16.msra.mxu0 %v2086_v19  ;;  %1391 = vmatprep.subr.bf16.mxu1 %v2091_v20  ;;  %v2182_v19 = vld [vmem:[%s2982_s1 + $0x510] ss:$8 sps:$4 sm:$0xff]   ;;  %v2257_v20 = vld [vmem:[%s2983_s0 + $0x6c] ss:$48 sps:$4 sm:$0xff]  }
  0x51   :  { %1550 = vmatprep.subr.bf16.mxu0 %v2094_v21  ;;  %v2187_v21 = vld [vmem:[%s2982_s1 + $0x224] ss:$8 sps:$4 sm:$0xff]  }
  0x53   :  { %1392 = vmatpush1.bf16.msra.mxu1 %v2089_v22  ;;  %v2259_v22 = vld [vmem:[%s2983_s0 + $0x84] ss:$48 sps:$4 sm:$0xff]  }
  0x54   :  { %1551 = vmatpush1.bf16.msra.mxu0 %v2092_v23  ;;  %1393 = vmatprep.subr.bf16.mxu1 %v2097_v24  ;;  %v2190_v23 = vld [vmem:[%s2982_s1 + $0x524] ss:$8 sps:$4 sm:$0xff]   ;;  %v2185_v24 = vld [vmem:[%s2982_s1 + $0x220] ss:$8 sps:$4 sm:$0xff]  }
  0x55   :  { %1552 = vmatprep.subr.bf16.mxu0 %v2100_v25  ;;  %v2188_v25 = vld [vmem:[%s2982_s1 + $0x520] ss:$8 sps:$4 sm:$0xff]  }
  0x57   :  { %1394 = vmatpush1.bf16.msra.mxu1 %v2095_v26  ;;  %v2261_v26 = vld [vmem:[%s2983_s0 + $0x68] ss:$48 sps:$4 sm:$0xff]  }
  0x58   :  { %1553 = vmatpush1.bf16.msra.mxu0 %v2098_v27  ;;  %1395 = vmatprep.subr.bf16.mxu1 %v2103_v29  ;;  %v2265_v27 = vld [vmem:[%s2983_s0 + $0x80] ss:$48 sps:$4 sm:$0xff]   ;;  %v2196_v29 = vld [vmem:[%s2982_s1 + $0x534] ss:$8 sps:$4 sm:$0xff]  }
  0x59   :  { %1554 = vmatprep.subr.bf16.mxu0 %v2106_v30  ;;  %v2191_v30 = vld [vmem:[%s2982_s1 + $0x230] ss:$8 sps:$4 sm:$0xff]  }
  0x5b   :  { %1396 = vmatpush1.bf16.msra.mxu1 %v2101_v32  ;;  %v2199_v32 = vld [vmem:[%s2982_s1 + $0x244] ss:$8 sps:$4 sm:$0xff]  }
  0x5c   :  { %1555 = vmatpush1.bf16.msra.mxu0 %v2104_v33  ;;  %1397 = vmatprep.subr.bf16.mxu1 %v2109_v36  ;;  %v2277_v33 = vld [vmem:[%s2983_s0 + $0x14] ss:$48 sps:$4 sm:$0xff]   ;;  %v2197_v36 = vld [vmem:[%s2982_s1 + $0x240] ss:$8 sps:$4 sm:$0xff]  }
  0x5d   :  { %1556 = vmatprep.subr.bf16.mxu0 %v2112_v37  ;;  %v2200_v37 = vld [vmem:[%s2982_s1 + $0x540] ss:$8 sps:$4 sm:$0xff]  }
  0x5f   :  { %1398 = vmatpush1.bf16.msra.mxu1 %v2107_v38  ;;  %v2205_v38 = vld [vmem:[%s2982_s1 + $0x254] ss:$8 sps:$4 sm:$0xff]  }
  0x60   :  { %1557 = vmatpush1.bf16.msra.mxu0 %v2110_v39  ;;  %1399 = vmatprep.subr.bf16.mxu1 %v2115_v41  ;;  %v2208_v39 = vld [vmem:[%s2982_s1 + $0x554] ss:$8 sps:$4 sm:$0xff]   ;;  %v2206_v41 = vld [vmem:[%s2982_s1 + $0x550] ss:$8 sps:$4 sm:$0xff]  }
  0x61   :  { %1558 = vmatprep.subr.bf16.mxu0 %v2118_v42  ;;  %v2211_v42 = vld [vmem:[%s2982_s1 + $0x264] ss:$8 sps:$4 sm:$0xff]  }
  0x63   :  { %1400 = vmatpush1.bf16.msra.mxu1 %v2113_v44  ;;  %v2209_v44 = vld [vmem:[%s2982_s1 + $0x260] ss:$8 sps:$4 sm:$0xff]  }
  0x64   :  { %1559 = vmatpush1.bf16.msra.mxu0 %v2116_v45  ;;  %1401 = vmatprep.subr.bf16.mxu1 %v2121_v46  ;;  %v2212_v45 = vld [vmem:[%s2982_s1 + $0x560] ss:$8 sps:$4 sm:$0xff]   ;;  %v2217_v46 = vld [vmem:[%s2982_s1 + $0x274] ss:$8 sps:$4 sm:$0xff]  }
  0x65   :  { %1560 = vmatprep.subr.bf16.mxu0 %v2124_v47  ;;  %v2220_v47 = vld [vmem:[%s2982_s1 + $0x574] ss:$8 sps:$4 sm:$0xff]  }
  0x67   :  { %1402 = vmatpush1.bf16.msra.mxu1 %v2119_v48  ;;  %v2215_v48 = vld [vmem:[%s2982_s1 + $0x270] ss:$8 sps:$4 sm:$0xff]  }
  0x68   :  { %1561 = vmatpush1.bf16.msra.mxu0 %v2122_v49  ;;  %1403 = vmatprep.subr.bf16.mxu1 %v2127_v50  ;;  %v2218_v49 = vld [vmem:[%s2982_s1 + $0x570] ss:$8 sps:$4 sm:$0xff]   ;;  %v2223_v50 = vld [vmem:[%s2982_s1 + $0x284] ss:$8 sps:$4 sm:$0xff]  }
  0x69   :  { %1562 = vmatprep.subr.bf16.mxu0 %v2130_v51  ;;  %v2226_v51 = vld [vmem:[%s2982_s1 + $0x584] ss:$8 sps:$4 sm:$0xff]  }
  0x6b   :  { %1404 = vmatpush1.bf16.msra.mxu1 %v2125_v52  ;;  %v2221_v52 = vld [vmem:[%s2982_s1 + $0x280] ss:$8 sps:$4 sm:$0xff]  }
  0x6c   :  { %1563 = vmatpush1.bf16.msra.mxu0 %v2128_v53  ;;  %1405 = vmatprep.subr.bf16.mxu1 %v2133_v54  ;;  %v2224_v53 = vld [vmem:[%s2982_s1 + $0x580] ss:$8 sps:$4 sm:$0xff]   ;;  %v2229_v54 = vld [vmem:[%s2982_s1 + $0x294] ss:$8 sps:$4 sm:$0xff]  }
  0x6d   :  { %1564 = vmatprep.subr.bf16.mxu0 %v2136_v55  ;;  %v2232_v55 = vld [vmem:[%s2982_s1 + $0x594] ss:$8 sps:$4 sm:$0xff]  }
  0x6f   :  { %1406 = vmatpush1.bf16.msra.mxu1 %v2131_v56  ;;  %v2227_v56 = vld [vmem:[%s2982_s1 + $0x290] ss:$8 sps:$4 sm:$0xff]  }
  0x70   :  { %1565 = vmatpush1.bf16.msra.mxu0 %v2134_v57  ;;  %1407 = vmatprep.subr.bf16.mxu1 %v2139_v58  ;;  %v2230_v57 = vld [vmem:[%s2982_s1 + $0x590] ss:$8 sps:$4 sm:$0xff]   ;;  %v2235_v58 = vld [vmem:[%s2982_s1 + $0x2a4] ss:$8 sps:$4 sm:$0xff]  }
  0x71   :  { %1566 = vmatprep.subr.bf16.mxu0 %v2142_v59  ;;  %v2238_v59 = vld [vmem:[%s2982_s1 + $0x5a4] ss:$8 sps:$4 sm:$0xff]  }
  0x73   :  { %1408 = vmatpush1.bf16.msra.mxu1 %v2137_v60  ;;  %v2233_v60 = vld [vmem:[%s2982_s1 + $0x2a0] ss:$8 sps:$4 sm:$0xff]  }
  0x74   :  { %1567 = vmatpush1.bf16.msra.mxu0 %v2140_v61  ;;  %1409 = vmatprep.subr.bf16.mxu1 %v2145_v62  ;;  %v2236_v61 = vld [vmem:[%s2982_s1 + $0x5a0] ss:$8 sps:$4 sm:$0xff]   ;;  %v2241_v62 = vld [vmem:[%s2982_s1 + $0x2b4] ss:$8 sps:$4 sm:$0xff]  }
  0x75   :  { %1568 = vmatprep.subr.bf16.mxu0 %v2148_v63  ;;  %v2244_v63 = vld [vmem:[%s2982_s1 + $0x5b4] ss:$8 sps:$4 sm:$0xff]  }
  0x77   :  { %1410 = vmatpush1.bf16.msra.mxu1 %v2143_v0  ;;  %v2239_v0 = vld [vmem:[%s2982_s1 + $0x2b0] ss:$8 sps:$4 sm:$0xff]  }
  0x78   :  { %1569 = vmatpush1.bf16.msra.mxu0 %v2146_v1  ;;  %1411 = vmatprep.subr.bf16.mxu1 %v2153_v2  ;;  %v2242_v1 = vld [vmem:[%s2982_s1 + $0x5b0] ss:$8 sps:$4 sm:$0xff]   ;;  %v2247_v2 = vld [vmem:[%s2982_s1 + $0x2c4] ss:$8 sps:$4 sm:$0xff]  }
  0x79   :  { %1570 = vmatprep.subr.bf16.mxu0 %v2158_v3  ;;  %v2250_v3 = vld [vmem:[%s2982_s1 + $0x5c4] ss:$8 sps:$4 sm:$0xff]  }
  0x7b   :  { %1412 = vmatpush1.bf16.msra.mxu1 %v2151_v4  ;;  %v2245_v4 = vld [vmem:[%s2982_s1 + $0x2c0] ss:$8 sps:$4 sm:$0xff]  }
  0x7c   :  { %1571 = vmatpush1.bf16.msra.mxu0 %v2156_v5  ;;  %1413 = vmatprep.subr.bf16.mxu1 %v2163_v6  ;;  %v2248_v5 = vld [vmem:[%s2982_s1 + $0x5c0] ss:$8 sps:$4 sm:$0xff]   ;;  %v2253_v6 = vld [vmem:[%s2982_s1 + $0x2d4] ss:$8 sps:$4 sm:$0xff]  }
  0x7d   :  { %1572 = vmatprep.subr.bf16.mxu0 %v2166_v7  ;;  %v2256_v7 = vld [vmem:[%s2982_s1 + $0x5d4] ss:$8 sps:$4 sm:$0xff]  }
  0x7f   :  { %1414 = vmatpush1.bf16.msra.mxu1 %v2161_v8  ;;  %v2251_v8 = vld [vmem:[%s2982_s1 + $0x2d0] ss:$8 sps:$4 sm:$0xff]  }
  0x80   :  { %1573 = vmatpush1.bf16.msra.mxu0 %v2164_v9  ;;  %1436 = vmatprep.subr.bf16.mxu1 %v2172_v10  ;;  %v2254_v9 = vld [vmem:[%s2982_s1 + $0x5d0] ss:$8 sps:$4 sm:$0xff]   ;;  %v2264_v10 = vld [vmem:[%s2982_s1 + $0x2e4] ss:$8 sps:$4 sm:$0xff]  }
  0x81   :  { %1595 = vmatprep.subr.bf16.mxu0 %v2178_v11  ;;  %v2268_v11 = vld [vmem:[%s2982_s1 + $0x5e4] ss:$8 sps:$4 sm:$0xff]  }
  0x82   :  { %1416 = vmatmul.mubr.bf16.vlgmr.msra.gmra.mrb[0].mxu1 %v2167_v12  ;;  %v2262_v12 = vld [vmem:[%s2982_s1 + $0x2e0] ss:$8 sps:$4 sm:$0xff]  }
  0x83   :  { %1575 = vmatmul.mubr.bf16.vlgmr.msra.gmra.mrb[0].mxu0 %v2173_v14  ;;  %1437 = vmatpush1.bf16.msra.mxu1 %v2170_v13  ;;  %v2266_v13 = vld [vmem:[%s2982_s1 + $0x5e0] ss:$8 sps:$4 sm:$0xff]   ;;  %v2271_v14 = vld [vmem:[%s2982_s1 + $0x2f4] ss:$8 sps:$4 sm:$0xff]  }
  0x84   :  { %1596 = vmatpush1.bf16.msra.mxu0 %v2176_v15  ;;  %1438 = vmatprep.subr.bf16.mxu1 %v2181_v16  ;;  %v2274_v15 = vld [vmem:[%s2982_s1 + $0x5f4] ss:$8 sps:$4 sm:$0xff]   ;;  %v2269_v16 = vld [vmem:[%s2982_s1 + $0x2f0] ss:$8 sps:$4 sm:$0xff]  }
  0x85   :  { %1597 = vmatprep.subr.bf16.mxu0 %v2184_v17  ;;  %1425 = vmatprep.mubr.bf16.mxu1 %v2257_v20  ;;  %v2272_v17 = vld [vmem:[%s2982_s1 + $0x5f0] ss:$8 sps:$4 sm:$0xff]   ;;  %v2281_v20 = vld [vmem:[%s2983_s0 + $0x74] ss:$48 sps:$4 sm:$0xff]  }
  0x86   :  { %1584 = vmatprep.mubr.bf16.mxu0 %v2259_v22  ;;  %v2285_v22 = vld [vmem:[%s2983_s0 + $0x70] ss:$48 sps:$4 sm:$0xff]  }
  0x87   :  { %1439 = vmatpush1.bf16.msra.mxu1 %v2179_v18  ;;  %v2275_v18 = vld [vmem:[%s2983_s0 + $0x10] ss:$48 sps:$4 sm:$0xff]  }
  0x88   :  { %1598 = vmatpush1.bf16.msra.mxu0 %v2182_v19  ;;  %1440 = vmatprep.subr.bf16.mxu1 %v2187_v21  ;;  %v2278_v19 = vld [vmem:[%s2983_s0 + $0x28] ss:$48 sps:$4 sm:$0xff]   ;;  %v2283_v21 = vld [vmem:[%s2983_s0 + $0x8c] ss:$48 sps:$4 sm:$0xff]  }
  0x89   :  { %1599 = vmatprep.subr.bf16.mxu0 %v2190_v23  ;;  %v2286_v23 = vld [vmem:[%s2983_s0 + $0x88] ss:$48 sps:$4 sm:$0xff]  }
  0x8a   :  { %1426 = vmatmul.mubr.bf16.gmra.mrb[4].mxu1 %v2261_v26 }
  0x8b   :  { %1585 = vmatmul.mubr.bf16.gmra.mrb[4].mxu0 %v2265_v27  ;;  %1441 = vmatpush1.bf16.msra.mxu1 %v2185_v24  ;;  %v1677_v24 = vlaneseq  ;;  %v1675_v27 = vld [vmem:[%s2984_s2] sm:$0x3] }
  0x8c   :  { %1600 = vmatpush1.bf16.msra.mxu0 %v2188_v25  ;;  %1442 = vmatprep.subr.bf16.mxu1 %v2193_v28 }
  0x8d   :  { %1601 = vmatprep.subr.bf16.mxu0 %v2196_v29  ;;  %1468 = vmatprep.mubr.bf16.mxu1 %v2277_v33  ;;  %v1678_v25 = vshrl.u32 %v1677_v24, 7 }
  0x8e   :  { %1627 = vmatprep.mubr.bf16.mxu0 %v2280_v35 }
  0x8f   :  { %1443 = vmatpush1.bf16.msra.mxu1 %v2191_v30  ;;  %v1679_v26 = vsub.s32 0, %v1678_v25  ;;  %v1683_v28 = vsub.s32 1, %v1678_v25 }
  0x90   :  { %1602 = vmatpush1.bf16.msra.mxu0 %v2194_v31  ;;  %1444 = vmatprep.subr.bf16.mxu1 %v2199_v32 }
  0x91   :  { %1603 = vmatprep.subr.bf16.mxu0 %v2202_v34  ;;  %v1680_v29 = vrot.slane %v1675_v27, %v1679_v26  ;;  %v1684_v32 = vrot.slane %v1675_v27, %v1683_v28 }
  0x93   :  { %1445 = vmatpush1.bf16.msra.mxu1 %v2197_v36 }
  0x94   :  { %1604 = vmatpush1.bf16.msra.mxu0 %v2200_v37  ;;  %1446 = vmatprep.subr.bf16.mxu1 %v2205_v38 }
  0x95   :  { %1605 = vmatprep.subr.bf16.mxu0 %v2208_v39 }
  0x97   :  { %1447 = vmatpush1.bf16.msra.mxu1 %v2203_v40 }
  0x98   :  { %1606 = vmatpush1.bf16.msra.mxu0 %v2206_v41  ;;  %1448 = vmatprep.subr.bf16.mxu1 %v2211_v42 }
  0x99   :  { %1607 = vmatprep.subr.bf16.mxu0 %v2214_v43 }
  0x9b   :  { %1449 = vmatpush1.bf16.msra.mxu1 %v2209_v44 }
  0x9c   :  { %1608 = vmatpush1.bf16.msra.mxu0 %v2212_v45  ;;  %1450 = vmatprep.subr.bf16.mxu1 %v2217_v46 }
  0x9d   :  { %1609 = vmatprep.subr.bf16.mxu0 %v2220_v47 }
  0x9f   :  { %1451 = vmatpush1.bf16.msra.mxu1 %v2215_v48 }
  0xa0   :  { %1610 = vmatpush1.bf16.msra.mxu0 %v2218_v49  ;;  %1452 = vmatprep.subr.bf16.mxu1 %v2223_v50 }
  0xa1   :  { %1611 = vmatprep.subr.bf16.mxu0 %v2226_v51 }
  0xa3   :  { %1453 = vmatpush1.bf16.msra.mxu1 %v2221_v52 }
  0xa4   :  { %1612 = vmatpush1.bf16.msra.mxu0 %v2224_v53  ;;  %1454 = vmatprep.subr.bf16.mxu1 %v2229_v54 }
  0xa5   :  { %1613 = vmatprep.subr.bf16.mxu0 %v2232_v55 }
  0xa7   :  { %1455 = vmatpush1.bf16.msra.mxu1 %v2227_v56 }
  0xa8   :  { %1614 = vmatpush1.bf16.msra.mxu0 %v2230_v57  ;;  %1456 = vmatprep.subr.bf16.mxu1 %v2235_v58 }
  0xa9   :  { %1615 = vmatprep.subr.bf16.mxu0 %v2238_v59 }
  0xab   :  { %1457 = vmatpush1.bf16.msra.mxu1 %v2233_v60 }
  0xac   :  { %1616 = vmatpush1.bf16.msra.mxu0 %v2236_v61  ;;  %1458 = vmatprep.subr.bf16.mxu1 %v2241_v62 }
  0xad   :  { %1617 = vmatprep.subr.bf16.mxu0 %v2244_v63 }
  0xaf   :  { %1459 = vmatpush1.bf16.msra.mxu1 %v2239_v0 }
  0xb0   :  { %1618 = vmatpush1.bf16.msra.mxu0 %v2242_v1  ;;  %1460 = vmatprep.subr.bf16.mxu1 %v2247_v2 }
  0xb1   :  { %1619 = vmatprep.subr.bf16.mxu0 %v2250_v3 }
  0xb3   :  { %1461 = vmatpush1.bf16.msra.mxu1 %v2245_v4 }
  0xb4   :  { %1620 = vmatpush1.bf16.msra.mxu0 %v2248_v5  ;;  %1462 = vmatprep.subr.bf16.mxu1 %v2253_v6 }
  0xb5   :  { %1621 = vmatprep.subr.bf16.mxu0 %v2256_v7 }
  0xb7   :  { %1463 = vmatpush1.bf16.msra.mxu1 %v2251_v8 }
  0xb8   :  { %1622 = vmatpush1.bf16.msra.mxu0 %v2254_v9  ;;  %1464 = vmatprep.subr.bf16.mxu1 %v2264_v10 }
  0xb9   :  { %1623 = vmatprep.subr.bf16.mxu0 %v2268_v11 }
  0xbb   :  { %1465 = vmatpush1.bf16.msra.mxu1 %v2262_v12 }
  0xbc   :  { %1624 = vmatpush1.bf16.msra.mxu0 %v2266_v13  ;;  %1466 = vmatprep.subr.bf16.mxu1 %v2271_v14 }
  0xbd   :  { %1625 = vmatprep.subr.bf16.mxu0 %v2274_v15 }
  0xbf   :  { %1467 = vmatpush1.bf16.msra.mxu1 %v2269_v16 }
  0xc0   :  { %1626 = vmatpush1.bf16.msra.mxu0 %v2272_v17 }
  0xc2   :  { %1469 = vmatmul.mubr.bf16.vlgmr.msra.gmra.mrb[0].mxu1 %v2275_v18 }
  0xc3   :  { %1628 = vmatmul.mubr.bf16.vlgmr.msra.gmra.mrb[0].mxu0 %v2278_v19  ;;  %1478 = vmatprep.mubr.bf16.mxu1 %v2281_v20 }
  0xc4   :  { %1637 = vmatprep.mubr.bf16.mxu0 %v2283_v21 }
  0xca   :  { %1479 = vmatmul.mubr.bf16.gmra.mrb[4].mxu1 %v2285_v22 }
  0xcb   :  { %1638 = vmatmul.mubr.bf16.gmra.mrb[4].mxu0 %v2286_v23 }
 0x195   :  { %v1470_v30 = vpop.f32.mrb[0].mxu1 }
 0x196   :  { %v1629_v31 = vpop.f32.mrb[0].mxu0  ;;  %v1472_v34 = vpop.f32.mrb[1].mxu1 }
 0x197   :  { %v1923_v33 = vadd.f32 %v1629_v31, %v1470_v30  ;;  %v1631_v35 = vpop.f32.mrb[1].mxu0  ;;  %v1474_v37 = vpop.f32.mrb[2].mxu1 }
 0x198   :  { %v1924_v36 = vadd.f32 %v1631_v35, %v1472_v34  ;;  %v1633_v38 = vpop.f32.mrb[2].mxu0  ;;  %v1476_v41 = vpop.f32.mrb[3].mxu1 }
 0x199   :  { %v1687_v39 = vadd.f32 %v1923_v33, %v1680_v29  ;;  %v1925_v40 = vadd.f32 %v1633_v38, %v1474_v37  ;;  %v1635_v42 = vpop.f32.mrb[3].mxu0 }
 0x19a   :  { %v1688_v43 = vadd.f32 %v1924_v36, %v1684_v32  ;;  %v1926_v44 = vadd.f32 %v1635_v42, %v1476_v41 }
 0x19b   :  { %1695 = vst [vmem:[%s2985_s3] sm:$0xff] %v1687_v39  ;;  %v1689_v45 = vadd.f32 %v1925_v40, %v1680_v29 }
 0x19c   :  { %1696 = vst [vmem:[%s2985_s3 + $0x8] sm:$0xff] %v1688_v43  ;;  %v1690_v46 = vadd.f32 %v1926_v44, %v1684_v32 }
 0x19d   :  { %1697 = vst [vmem:[%s2985_s3 + $0x10] sm:$0xff] %v1689_v45  ;;  %v1480_v47 = vpop.f32.mrb[4].mxu1 }
 0x19e   :  { %1698 = vst [vmem:[%s2985_s3 + $0x18] sm:$0xff] %v1690_v46  ;;  %v1639_v48 = vpop.f32.mrb[4].mxu0  ;;  %v1482_v50 = vpop.f32.mrb[5].mxu1 }
 0x19f   :  { %v1927_v49 = vadd.f32 %v1639_v48, %v1480_v47  ;;  %v1641_v51 = vpop.f32.mrb[5].mxu0  ;;  %v1484_v53 = vpop.f32.mrb[6].mxu1 }
 0x1a0   :  { %v1928_v52 = vadd.f32 %v1641_v51, %v1482_v50  ;;  %v1643_v54 = vpop.f32.mrb[6].mxu0  ;;  %v1486_v57 = vpop.f32.mrb[7].mxu1 }
 0x1a1   :  { %v1691_v55 = vadd.f32 %v1927_v49, %v1680_v29  ;;  %v1929_v56 = vadd.f32 %v1643_v54, %v1484_v53  ;;  %v1645_v58 = vpop.f32.mrb[7].mxu0 }
 0x1a2   :  { %v1692_v59 = vadd.f32 %v1928_v52, %v1684_v32  ;;  %v1930_v60 = vadd.f32 %v1645_v58, %v1486_v57 }
 0x1a3   :  { %1699 = vst [vmem:[%s2985_s3 + $0x20] sm:$0xff] %v1691_v55  ;;  %v1693_v61 = vadd.f32 %v1929_v56, %v1680_v29 }
 0x1a4   :  { %1700 = vst [vmem:[%s2985_s3 + $0x28] sm:$0xff] %v1692_v59  ;;  %v1694_v62 = vadd.f32 %v1930_v60, %v1684_v32 }
 0x1a5   :  { %1701 = vst [vmem:[%s2985_s3 + $0x30] sm:$0xff] %v1693_v61 }
 0x1a6   :  { %1702 = vst [vmem:[%s2985_s3 + $0x38] sm:$0xff] %v1694_v62 }

// kernel: forward.3
= control target key start
LH: loop header
LB: loop body
LE: loop exit
PB: predicated region body
PF: predicated region fallthrough
CT: control target
= control target key end

     0   :  { %vm19_vm0 = vcmask 261120   ;;  %v352_v20 = vmov 0.0   ;;  %s460_s1 = inlined_call_operand.vmem [shape: bf16[256,32], index: 1, kind: input, shape index: {}]   ;;  %s461_s0 = inlined_call_operand.vmem [shape: bf16[32,256], index: 0, kind: input, shape index: {}]   ;;  %s462_s2 = inlined_call_operand.vmem [shape: f32[1,32], index: 2, kind: input, shape index: {}]   ;;  %s463_s3 = inlined_call_operand.vmem [shape: f32[32,32], index: 3, kind: output, shape index: {}]  }
   0x1   :  { %v330_v0 = vld [vmem:[%s460_s1 + $0x40] sm:$0xff]   ;;  %v332_v2 = vld [vmem:[%s460_s1 + $0x48] sm:$0xff]   ;;  %v334_v4 = vld [vmem:[%s460_s1 + $0x50] sm:$0xff]   ;;  %20 = vst.msk [vmem:[#allocation2] sm:$0xff] %vm19_vm0, %v352_v20 }
   0x2   :  { %v331_v1 = vld [vmem:[%s460_s1] sm:$0xff]   ;;  %285 = vmatprep.subr.bf16.mxu0 %v330_v0  ;;  %313 = vmatprep.subr.bf16.mxu1 %v330_v0  ;;  %v333_v3 = vld [vmem:[%s460_s1 + $0x8] sm:$0xff]   ;;  %v335_v5 = vld [vmem:[%s460_s1 + $0x10] sm:$0xff]   ;;  %21 = vst.msk [vmem:[#allocation2 + $0x8] sm:$0xff] %vm19_vm0, %v352_v20 }
   0x3   :  { %286 = vmatpush3.bf16.msra.mxu0 %v331_v1  ;;  %321 = vmatpush3.bf16.msra.mxu1 %v331_v1  ;;  %v336_v6 = vld [vmem:[%s460_s1 + $0x58] sm:$0xff]   ;;  %v338_v8 = vld [vmem:[%s460_s1 + $0x60] sm:$0xff]   ;;  %v340_v10 = vld [vmem:[%s460_s1 + $0x68] sm:$0xff]   ;;  %22 = vst.msk [vmem:[#allocation2 + $0x10] sm:$0xff] %vm19_vm0, %v352_v20 }
   0x4   :  { %287 = vmatprep.subr.bf16.mxu0 %v332_v2  ;;  %314 = vmatprep.subr.bf16.mxu1 %v332_v2  ;;  %v337_v7 = vld [vmem:[%s460_s1 + $0x18] sm:$0xff]   ;;  %v339_v9 = vld [vmem:[%s460_s1 + $0x20] sm:$0xff]   ;;  %v341_v13 = vld [vmem:[%s460_s1 + $0x28] sm:$0xff]   ;;  %23 = vst.msk [vmem:[#allocation2 + $0x18] sm:$0xff] %vm19_vm0, %v352_v20 }
   0x5   :  { %v348_v11 = vld [vmem:[%s461_s0 + $0x4] ss:$8 sps:$4 sm:$0xff]   ;;  %v351_v12 = vld [vmem:[%s461_s0 + $0x14] ss:$8 sps:$4 sm:$0xff]   ;;  %v346_v18 = vld [vmem:[%s461_s0] ss:$8 sps:$4 sm:$0xff]  }
   0x6   :  { %v342_v14 = vld [vmem:[%s460_s1 + $0x70] sm:$0xff]   ;;  %212 = vmatprep.mubr.bf16.mxu0 %v348_v11  ;;  %220 = vmatprep.mubr.bf16.mxu1 %v351_v12  ;;  %v344_v16 = vld [vmem:[%s460_s1 + $0x78] sm:$0xff]   ;;  %v284_v41 = vld [vmem:[%s462_s2] ss:$0 sm:$0xff] }
   0x7   :  { %288 = vmatpush3.bf16.msra.mxu0 %v333_v3  ;;  %322 = vmatpush3.bf16.msra.mxu1 %v333_v3  ;;  %v343_v15 = vld [vmem:[%s460_s1 + $0x30] sm:$0xff]   ;;  %v345_v17 = vld [vmem:[%s460_s1 + $0x38] sm:$0xff]  }
   0x8   :  { %289 = vmatprep.subr.bf16.mxu0 %v334_v4  ;;  %315 = vmatprep.subr.bf16.mxu1 %v334_v4  ;;  %v349_v19 = vld [vmem:[%s461_s0 + $0x10] ss:$8 sps:$4 sm:$0xff]   ;;  %v24_v23 = vld [vmem:[#allocation2] sm:$0xff] }
   0x9   :  { %v25_v31 = vld [vmem:[#allocation2 + $0x8] sm:$0xff] }
   0xa   :  { %v26_v25 = vld [vmem:[#allocation2 + $0x10] sm:$0xff] }
   0xb   :  { %290 = vmatpush3.bf16.msra.mxu0 %v335_v5  ;;  %323 = vmatpush3.bf16.msra.mxu1 %v335_v5  ;;  %v27_v33 = vld [vmem:[#allocation2 + $0x18] sm:$0xff] }
   0xc   :  { %291 = vmatprep.subr.bf16.mxu0 %v336_v6  ;;  %316 = vmatprep.subr.bf16.mxu1 %v336_v6 }
   0xf   :  { %292 = vmatpush3.bf16.msra.mxu0 %v337_v7  ;;  %324 = vmatpush3.bf16.msra.mxu1 %v337_v7 }
  0x10   :  { %293 = vmatprep.subr.bf16.mxu0 %v338_v8  ;;  %317 = vmatprep.subr.bf16.mxu1 %v338_v8 }
  0x13   :  { %294 = vmatpush3.bf16.msra.mxu0 %v339_v9  ;;  %325 = vmatpush3.bf16.msra.mxu1 %v339_v9 }
  0x14   :  { %295 = vmatprep.subr.bf16.mxu0 %v340_v10  ;;  %318 = vmatprep.subr.bf16.mxu1 %v340_v10 }
  0x17   :  { %296 = vmatpush3.bf16.msra.mxu0 %v341_v13  ;;  %326 = vmatpush3.bf16.msra.mxu1 %v341_v13 }
  0x18   :  { %297 = vmatprep.subr.bf16.mxu0 %v342_v14  ;;  %319 = vmatprep.subr.bf16.mxu1 %v342_v14 }
  0x1b   :  { %298 = vmatpush3.bf16.msra.mxu0 %v343_v15  ;;  %327 = vmatpush3.bf16.msra.mxu1 %v343_v15 }
  0x1c   :  { %299 = vmatprep.subr.bf16.mxu0 %v344_v16  ;;  %320 = vmatprep.subr.bf16.mxu1 %v344_v16 }
  0x1f   :  { %300 = vmatpush3.bf16.msra.mxu0 %v345_v17  ;;  %328 = vmatpush3.bf16.msra.mxu1 %v345_v17 }
  0x22   :  { %213 = vmatmul.mubr.bf16.vlgmr.msra.gmra.mrb[0].mxu0 %v346_v18  ;;  %221 = vmatmul.mubr.bf16.vlgmr.msra.gmra.mrb[0].mxu1 %v349_v19 }
  0xf5   :  { %v301_v21 = vpop.f32.mrb[0].mxu0  ;;  %v307_v22 = vpop.f32.mrb[0].mxu1 }
  0xf6   :  { %v302_v24 = vpop.f32.mrb[1].mxu0  ;;  %v308_v26 = vpop.f32.mrb[1].mxu1 }
  0xf7   :  { %v303_v27 = vadd.f32 %v302_v24, %v301_v21  ;;  %v309_v28 = vadd.f32 %v308_v26, %v307_v22  ;;  %v304_v29 = vpop.f32.mrb[2].mxu0  ;;  %v310_v30 = vpop.f32.mrb[2].mxu1 }
  0xf8   :  { %v305_v32 = vpop.f32.mrb[3].mxu0  ;;  %v311_v34 = vpop.f32.mrb[3].mxu1 }
  0xf9   :  { %v229_v35 = vadd.f32 %v303_v27, %v24_v23  ;;  %v231_v36 = vadd.f32 %v309_v28, %v26_v25  ;;  %v306_v37 = vadd.f32 %v305_v32, %v304_v29  ;;  %v312_v38 = vadd.f32 %v311_v34, %v310_v30 }
  0xfb   :  { %234 = vst.msk [vmem:[#allocation2] sm:$0xff] %vm19_vm0, %v229_v35  ;;  %236 = vst.msk [vmem:[#allocation2 + $0x10] sm:$0xff] %vm19_vm0, %v231_v36  ;;  %v230_v39 = vadd.f32 %v306_v37, %v25_v31  ;;  %v232_v40 = vadd.f32 %v312_v38, %v27_v33 }
  0xfd   :  { %235 = vst.msk [vmem:[#allocation2 + $0x8] sm:$0xff] %vm19_vm0, %v230_v39  ;;  %237 = vst.msk [vmem:[#allocation2 + $0x18] sm:$0xff] %vm19_vm0, %v232_v40 }
 0x102   :  { %v241_v42 = vld [vmem:[#allocation2] sm:$0xff]  ;;  %v243_v43 = vld [vmem:[#allocation2 + $0x10] sm:$0xff] }
 0x103   :  { %v252_v44 = vadd.f32 %v284_v41, %v241_v42  ;;  %v254_v45 = vadd.f32 %v284_v41, %v243_v43 }
 0x104   :  { %v242_v46 = vld [vmem:[#allocation2 + $0x8] sm:$0xff]  ;;  %v244_v47 = vld [vmem:[#allocation2 + $0x18] sm:$0xff] }
 0x105   :  { %256 = vst.msk [vmem:[%s463_s3] sm:$0xff] %vm19_vm0, %v252_v44  ;;  %258 = vst.msk [vmem:[%s463_s3 + $0x10] sm:$0xff] %vm19_vm0, %v254_v45  ;;  %v253_v48 = vadd.f32 %v284_v41, %v242_v46  ;;  %v255_v49 = vadd.f32 %v284_v41, %v244_v47 }
 0x107   :  { %257 = vst.msk [vmem:[%s463_s3 + $0x8] sm:$0xff] %vm19_vm0, %v253_v48  ;;  %259 = vst.msk [vmem:[%s463_s3 + $0x18] sm:$0xff] %vm19_vm0, %v255_v49 }

</bundles_post_ra>
